<compile_context>
chip_gen: v7x
topology: tpu7x:2x2x1
jax: 0.10.0
libtpu: 0.0.40
codegen_flags: <defaults>
</compile_context>

<pallas_src>
import jax
import jax.numpy as jnp
from jax.experimental import pallas as pl
from jax.experimental.pallas import tpu as pltpu

N, CIN, H, W = 1, 112, 14, 14
COUT = 672
EPS = 1e-5
P = N * H * W      # 196
TC = 336           # COUT tile (2 grid steps; even split across v7x's 2 TensorCores)
assert COUT % TC == 0 and TC % 8 == 0


def fused_add_conv_bn_kernel(x1_ref, x2_ref, w_ref, gb_ref, o_ref):
    # elementwise add (VPU); tiny (112x196), recomputed per COUT tile — negligible
    z = x1_ref[...] + x2_ref[...]                                      # [CIN, P]
    # 1x1 conv == channels-major matmul (MXU), f32 accumulate
    y = jnp.dot(w_ref[...], z, preferred_element_type=jnp.float32)     # [TC, P]

    # BatchNorm2d (training mode): batch stats per output channel, one read pass.
    s1 = jnp.sum(y, axis=-1, keepdims=True)                            # [TC, 1]
    s2 = jnp.sum(y * y, axis=-1, keepdims=True)                        # [TC, 1]
    inv_p = jnp.float32(1.0 / P)
    mean = s1 * inv_p
    var = jnp.maximum(s2 * inv_p - mean * mean, 0.0)                   # biased var, clamped
    inv = jax.lax.rsqrt(var + EPS)                                     # EUP

    gamma = gb_ref[:, 0:1]                                             # [TC, 1]
    beta = gb_ref[:, 1:2]                                              # [TC, 1]

    # fold per-channel affine into a single scale/shift, then one normalize pass
    scale = inv * gamma
    shift = beta - mean * scale
    o_ref[...] = (y * scale + shift).astype(o_ref.dtype)


def fused_add_conv_bn(x218, x204, conv_w, gamma, beta):
    # All wrapper ops below are pure reshapes / a tiny (672,2) stack — no transposes.
    x1 = x218.reshape(CIN, P)
    x2 = x204.reshape(CIN, P)
    w = conv_w.reshape(COUT, CIN)
    gb = jnp.stack([gamma, beta], axis=-1)                             # [COUT, 2]

    cost = pl.CostEstimate(
        flops=2 * P * CIN * COUT,
        transcendentals=COUT,
        bytes_accessed=4 * (2 * CIN * P + COUT * CIN + 2 * COUT + COUT * P),
    )

    n_tiles = COUT // TC
    out = pl.pallas_call(
        fused_add_conv_bn_kernel,
        out_shape=jax.ShapeDtypeStruct((COUT, P), jnp.float32),
        grid=(n_tiles,),
        in_specs=[
            pl.BlockSpec((CIN, P), lambda i: (0, 0)),       # x1 (same block every step)
            pl.BlockSpec((CIN, P), lambda i: (0, 0)),       # x2 (same block every step)
            pl.BlockSpec((TC, CIN), lambda i: (i, 0)),      # weight tile
            pl.BlockSpec((TC, 2), lambda i: (i, 0)),        # packed gamma/beta tile
        ],
        out_specs=pl.BlockSpec((TC, P), lambda i: (i, 0)),
        cost_estimate=cost,
        compiler_params=pltpu.CompilerParams(
            dimension_semantics=("parallel",),
        ),
    )(x1, x2, w, gb)

    # channels-major [COUT, P] -> NCHW is a free reshape
    return out.reshape(N, COUT, H, W)


def reference(x218, x204, conv_w, gamma, beta):
    z = (x218 + x204).reshape(CIN, P)                                   # [CIN, P]
    y = conv_w.reshape(COUT, CIN) @ z                                   # [COUT, P]
    mean = jnp.mean(y, axis=1, keepdims=True)
    var = jnp.mean((y - mean) ** 2, axis=1, keepdims=True)              # biased var
    o = (y - mean) / jnp.sqrt(var + EPS) * gamma.reshape(COUT, 1) + beta.reshape(COUT, 1)
    return o.reshape(N, COUT, H, W)


if __name__ == "__main__":
    key = jax.random.PRNGKey(0)
    k1, k2, k3, k4, k5 = jax.random.split(key, 5)

    x218 = jax.random.normal(k1, (N, CIN, H, W), dtype=jnp.float32)
    x204 = jax.random.normal(k2, (N, CIN, H, W), dtype=jnp.float32)

    # deterministic parameter init (synthetic, not a checkpoint)
    conv_w = jax.random.normal(k3, (COUT, CIN, 1, 1), dtype=jnp.float32) * 0.05
    gamma = 1.0 + 0.01 * jax.random.normal(k4, (COUT,), dtype=jnp.float32)
    beta = 0.01 * jax.random.normal(k5, (COUT,), dtype=jnp.float32)

    out = fused_add_conv_bn(x218, x204, conv_w, gamma, beta)
    out = jax.block_until_ready(out)

    ref = reference(x218, x204, conv_w, gamma, beta)
    assert out.shape == (N, COUT, H, W)
    assert jnp.allclose(out, ref, atol=1e-4, rtol=1e-4), float(jnp.max(jnp.abs(out - ref)))

    print("KERNEL_OK")
</pallas_src>

<mosaic_0001>
module attributes {stable_mosaic.version = 11 : i64} {
  func.func @fused_add_conv_bn_kernel(%arg0: i32, %arg1: memref<112x196xf32, #tpu.memory_space<vmem>>, %arg2: memref<112x196xf32, #tpu.memory_space<vmem>>, %arg3: memref<336x112xf32, #tpu.memory_space<vmem>>, %arg4: memref<336x2xf32, #tpu.memory_space<vmem>>, %arg5: memref<336x196xf32, #tpu.memory_space<vmem>>) attributes {dimension_semantics = [#tpu.dimension_semantics<parallel>], iteration_bounds = array<i64: 2>, scalar_prefetch = 0 : i64, scratch_operands = 0 : i64, tpu.core_type = #tpu.core_type<tc>, window_params = [{pipeline_mode = #tpu.pipeline_mode<synchronous>, transform_indices = @transform_0, window_bounds = array<i64: 112, 196>}, {pipeline_mode = #tpu.pipeline_mode<synchronous>, transform_indices = @transform_1, window_bounds = array<i64: 112, 196>}, {transform_indices = @transform_2, window_bounds = array<i64: 336, 112>}, {transform_indices = @transform_3, window_bounds = array<i64: 336, 2>}, {transform_indices = @transform_4, window_bounds = array<i64: 336, 196>}]} {
    %c0 = arith.constant 0 : index
    %c0_0 = arith.constant 0 : index
    %0 = vector.load %arg1[%c0, %c0_0] : memref<112x196xf32, #tpu.memory_space<vmem>>, vector<112x196xf32>
    %c0_1 = arith.constant 0 : index
    %c0_2 = arith.constant 0 : index
    %1 = vector.load %arg2[%c0_1, %c0_2] : memref<112x196xf32, #tpu.memory_space<vmem>>, vector<112x196xf32>
    %2 = arith.addf %0, %1 : vector<112x196xf32>
    %c0_3 = arith.constant 0 : index
    %c0_4 = arith.constant 0 : index
    %3 = vector.load %arg3[%c0_3, %c0_4] : memref<336x112xf32, #tpu.memory_space<vmem>>, vector<336x112xf32>
    %cst = arith.constant dense<0.000000e+00> : vector<336x196xf32>
    %4 = tpu.matmul %3, %2, %cst {dimension_numbers = #tpu.dot_dimension_numbers<[1], [0], [0], [1], [0, 0, 1, 1], [], []>} : vector<336x112xf32>, vector<112x196xf32>, vector<336x196xf32> -> vector<336x196xf32>
    %cst_5 = arith.constant dense<0.000000e+00> : vector<336xf32>
    %5 = vector.multi_reduction <add>, %4, %cst_5 [1] : vector<336x196xf32> to vector<336xf32>
    %6 = vector.shape_cast %5 : vector<336xf32> to vector<336x1xf32>
    %7 = arith.mulf %4, %4 : vector<336x196xf32>
    %cst_6 = arith.constant dense<0.000000e+00> : vector<336xf32>
    %8 = vector.multi_reduction <add>, %7, %cst_6 [1] : vector<336x196xf32> to vector<336xf32>
    %9 = vector.shape_cast %8 : vector<336xf32> to vector<336x1xf32>
    %cst_7 = arith.constant 0.00510204071 : f32
    %10 = vector.broadcast %cst_7 : f32 to vector<336x1xf32>
    %11 = arith.mulf %6, %10 : vector<336x1xf32>
    %cst_8 = arith.constant 0.00510204071 : f32
    %12 = vector.broadcast %cst_8 : f32 to vector<336x1xf32>
    %13 = arith.mulf %9, %12 : vector<336x1xf32>
    %14 = arith.mulf %11, %11 : vector<336x1xf32>
    %15 = arith.subf %13, %14 : vector<336x1xf32>
    %cst_9 = arith.constant 0.000000e+00 : f32
    %16 = vector.broadcast %cst_9 : f32 to vector<336x1xf32>
    %17 = arith.maximumf %15, %16 : vector<336x1xf32>
    %cst_10 = arith.constant 9.99999974E-6 : f32
    %18 = vector.broadcast %cst_10 : f32 to vector<336x1xf32>
    %19 = arith.addf %17, %18 : vector<336x1xf32>
    %20 = math.rsqrt %19 : vector<336x1xf32>
    %c0_11 = arith.constant 0 : index
    %c0_12 = arith.constant 0 : index
    %21 = vector.load %arg4[%c0_11, %c0_12] : memref<336x2xf32, #tpu.memory_space<vmem>>, vector<336x1xf32>
    %c0_13 = arith.constant 0 : index
    %c1 = arith.constant 1 : index
    %22 = vector.load %arg4[%c0_13, %c1] : memref<336x2xf32, #tpu.memory_space<vmem>>, vector<336x1xf32>
    %23 = arith.mulf %20, %21 : vector<336x1xf32>
    %24 = arith.mulf %11, %23 : vector<336x1xf32>
    %25 = arith.subf %22, %24 : vector<336x1xf32>
    %26 = vector.broadcast %23 : vector<336x1xf32> to vector<336x196xf32>
    %27 = arith.mulf %4, %26 : vector<336x196xf32>
    %28 = vector.broadcast %25 : vector<336x1xf32> to vector<336x196xf32>
    %29 = arith.addf %27, %28 : vector<336x196xf32>
    %c0_14 = arith.constant 0 : index
    %c0_15 = arith.constant 0 : index
    %30 = vector.load %arg5[%c0_14, %c0_15] : memref<336x196xf32, #tpu.memory_space<vmem>>, vector<336x196xf32>
    tpu.vector_store %arg5[%c0_14, %c0_15], %29 {strides = array<i32>} : memref<336x196xf32, #tpu.memory_space<vmem>>, vector<336x196xf32>,
    return
  }
  func.func @transform_0(%arg0: i32) -> (i32, i32) {
    %c0_i32 = arith.constant 0 : i32
    %c0_i32_0 = arith.constant 0 : i32
    %c0_i32_1 = arith.constant 0 : i32
    return %c0_i32, %c0_i32_0 : i32, i32
  }
  func.func @transform_1(%arg0: i32) -> (i32, i32) {
    %c0_i32 = arith.constant 0 : i32
    %c0_i32_0 = arith.constant 0 : i32
    %c0_i32_1 = arith.constant 0 : i32
    return %c0_i32, %c0_i32_0 : i32, i32
  }
  func.func @transform_2(%arg0: i32) -> (i32, i32) {
    %c0_i32 = arith.constant 0 : i32
    %c0_i32_0 = arith.constant 0 : i32
    return %arg0, %c0_i32 : i32, i32
  }
  func.func @transform_3(%arg0: i32) -> (i32, i32) {
    %c0_i32 = arith.constant 0 : i32
    %c0_i32_0 = arith.constant 0 : i32
    return %arg0, %c0_i32 : i32, i32
  }
  func.func @transform_4(%arg0: i32) -> (i32, i32) {
    %c0_i32 = arith.constant 0 : i32
    %c0_i32_0 = arith.constant 0 : i32
    return %arg0, %c0_i32 : i32, i32
  }
}

</mosaic_0001>

<bundles_post_ra>
// kernel: tpu_custom_call.1
= control target key start
LH: loop header
LB: loop body
LE: loop exit
PB: predicated region body
PF: predicated region fallthrough
CT: control target
= control target key end

     0   :  { %s2828_s15 = smov 0   ;;  %s4757_s0 = inlined_call_operand.vmem [shape: f32[112,196], index: 0, kind: input, shape index: {}]   ;;  %s4758_s1 = inlined_call_operand.vmem [shape: f32[112,196], index: 1, kind: input, shape index: {}]   ;;  %s4759_s2 = inlined_call_operand.vmem [shape: f32[672,112], index: 2, kind: input, shape index: {}]   ;;  %s4760_s3 = inlined_call_operand.vmem [shape: f32[672,2], index: 3, kind: input, shape index: {}]   ;;  %s4761_s4 = inlined_call_operand.vmem [shape: f32[672,196], index: 4, kind: output, shape index: {}]  }
   0x1 LB: > { %s2588_s16 = sadd.s32 4294967295, %s2797_s15   ;;  %p2592_p0 = scmp.ge.s32.totalorder %s2797_s15, 1  ;;  %s2797_s15 = sphi %s2828_s15, %s14_s15  }
   0x2   : > { %p174_p1 = scmp.lt.s32.totalorder %s2797_s15, 3 }
   0x4   : > { %p175_p2 = pnand %p2592_p0, %p174_p1 }
   0x6   : > { %178 = sbr.rel (%p175_p2) target bundleno = 875 (0x36b), region = 36 }
   0xd   : > { %v226_v0 = vld [vmem:[%s4757_s0 + $0x8] sm:$0xff]  ;;  %v228_v1 = vld [vmem:[%s4757_s0 + $0x18] sm:$0xff]  ;;  %v225_v5 = vld [vmem:[%s4757_s0] sm:$0xff]  ;;  %v2799_v7 = vmov 0.0   ;;  %s2966_s29 = smul.u32 42, %s2588_s16  ;;  %vm351_vm0 = vcmask 916480  }
   0xe   : > { %v254_v2 = vld [vmem:[%s4758_s1 + $0x8] sm:$0xff]  ;;  %v256_v3 = vld [vmem:[%s4758_s1 + $0x18] sm:$0xff]  ;;  %v227_v6 = vld [vmem:[%s4757_s0 + $0x10] sm:$0xff]  ;;  %542 = vmatprep.mubr.f32.mxu0 %v2799_v7  ;;  %668 = vmatprep.mubr.f32.mxu1 %v2799_v7  ;;  %vm795_vm1 = vcmask 556032   ;;  %s2801_s14 = smov 1  }
   0xf   : > { %v282_v4 = vadd.f32 %v254_v2, %v226_v0  ;;  %v284_v8 = vadd.f32 %v256_v3, %v228_v1  ;;  %v253_v9 = vld [vmem:[%s4758_s1] sm:$0xff]  ;;  %v255_v10 = vld [vmem:[%s4758_s1 + $0x10] sm:$0xff]  ;;  %v230_v11 = vld [vmem:[%s4757_s0 + $0x28] sm:$0xff]  ;;  %p207_p3 = scmp.lt.s32.totalorder %s2966_s29, 83 }
  0x10   : > { %v281_v12 = vadd.f32 %v253_v9, %v225_v5  ;;  %v283_v13 = vadd.f32 %v255_v10, %v227_v6  ;;  %v232_v14 = vld [vmem:[%s4757_s0 + $0x38] sm:$0xff]  ;;  %v258_v15 = vld [vmem:[%s4758_s1 + $0x28] sm:$0xff]  ;;  %v229_v20 = vld [vmem:[%s4757_s0 + $0x20] sm:$0xff] }
  0x11   : > { %v260_v16 = vld [vmem:[%s4758_s1 + $0x38] sm:$0xff]  ;;  %v2642_v17 = vpack.c.bf16 %v284_v8, %v282_v4  ;;  %v286_v18 = vadd.f32 %v258_v15, %v230_v11  ;;  %v231_v21 = vld [vmem:[%s4757_s0 + $0x30] sm:$0xff]  ;;  %v257_v22 = vld [vmem:[%s4758_s1 + $0x20] sm:$0xff]  ;;  %s5058_s29 = smov (!%p207_p3, %s2966_s29), 83 }
  0x12   : > { %v288_v19 = vadd.f32 %v260_v16, %v232_v14  ;;  %v2644_v23 = vpack.c.bf16 %v283_v13, %v281_v12  ;;  %v259_v24 = vld [vmem:[%s4758_s1 + $0x30] sm:$0xff]  ;;  %v285_v25 = vadd.f32 %v257_v22, %v229_v20  ;;  %v234_v26 = vld [vmem:[%s4757_s0 + $0x48] sm:$0xff]  ;;  %v236_v27 = vld [vmem:[%s4757_s0 + $0x58] sm:$0xff]  ;;  %s2593_s8 = sshll.u32 %s5058_s29, 3  ;;  %s2641_s17 = sshll.u32 %s5058_s29, 4 }
  0x13   : > { %2643 = vmatprep.subr.bf16.mxu0 %v2642_v17  ;;  %2670 = vmatprep.subr.bf16.mxu1 %v2642_v17  ;;  %v287_v29 = vadd.f32 %v259_v24, %v231_v21  ;;  %v262_v30 = vld [vmem:[%s4758_s1 + $0x48] sm:$0xff]  ;;  %v264_v31 = vld [vmem:[%s4758_s1 + $0x58] sm:$0xff]  ;;  %v233_v32 = vld [vmem:[%s4757_s0 + $0x40] sm:$0xff]  ;;  %s3022_s10 = scalar_lea.vmem %s4759_s2, %s2593_s8  ;;  %s3889_s13 = scalar_lea.vmem %s4760_s3, %s2593_s8 }
  0x14   : > { %v2646_v28 = vpack.c.bf16 %v288_v19, %v286_v18  ;;  %2645 = vmatpush1.bf16.msra.mxu0 %v2644_v23  ;;  %2677 = vmatpush1.bf16.msra.mxu1 %v2644_v23  ;;  %v290_v33 = vadd.f32 %v262_v30, %v234_v26  ;;  %v292_v34 = vadd.f32 %v264_v31, %v236_v27  ;;  %v235_v35 = vld [vmem:[%s4757_s0 + $0x50] sm:$0xff]  ;;  %v261_v36 = vld [vmem:[%s4758_s1 + $0x40] sm:$0xff]  ;;  %v238_v41 = vld [vmem:[%s4757_s0 + $0x68] sm:$0xff]  ;;  %s4514_s20 = scalar_lea.vmem %s4761_s4, %s2641_s17 }
  0x15   : > { %v263_v37 = vld [vmem:[%s4758_s1 + $0x50] sm:$0xff]  ;;  %v2648_v38 = vpack.c.bf16 %v287_v29, %v285_v25  ;;  %v289_v39 = vadd.f32 %v261_v36, %v233_v32  ;;  %v240_v42 = vld [vmem:[%s4757_s0 + $0x78] sm:$0xff]  ;;  %v266_v43 = vld [vmem:[%s4758_s1 + $0x68] sm:$0xff] }
  0x16   : > { %2647 = vmatprep.subr.bf16.mxu0 %v2646_v28  ;;  %2671 = vmatprep.subr.bf16.mxu1 %v2646_v28  ;;  %v291_v40 = vadd.f32 %v263_v37, %v235_v35  ;;  %v2650_v44 = vpack.c.bf16 %v292_v34, %v290_v33  ;;  %v268_v45 = vld [vmem:[%s4758_s1 + $0x78] sm:$0xff]  ;;  %v294_v46 = vadd.f32 %v266_v43, %v238_v41  ;;  %v237_v47 = vld [vmem:[%s4757_s0 + $0x60] sm:$0xff]  ;;  %v239_v48 = vld [vmem:[%s4757_s0 + $0x70] sm:$0xff] }
  0x17   : > { %v296_v49 = vadd.f32 %v268_v45, %v240_v42  ;;  %v265_v50 = vld [vmem:[%s4758_s1 + $0x60] sm:$0xff]  ;;  %v267_v51 = vld [vmem:[%s4758_s1 + $0x70] sm:$0xff]  ;;  %v242_v52 = vld [vmem:[%s4757_s0 + $0x88] sm:$0xff] }
  0x18   : > { %2649 = vmatpush1.bf16.msra.mxu0 %v2648_v38  ;;  %2678 = vmatpush1.bf16.msra.mxu1 %v2648_v38  ;;  %v2652_v53 = vpack.c.bf16 %v291_v40, %v289_v39  ;;  %v293_v54 = vadd.f32 %v265_v50, %v237_v47  ;;  %v295_v55 = vadd.f32 %v267_v51, %v239_v48  ;;  %v244_v56 = vld [vmem:[%s4757_s0 + $0x98] sm:$0xff]  ;;  %v270_v57 = vld [vmem:[%s4758_s1 + $0x88] sm:$0xff]  ;;  %v241_v62 = vld [vmem:[%s4757_s0 + $0x80] sm:$0xff] }
  0x19   : > { %v272_v58 = vld [vmem:[%s4758_s1 + $0x98] sm:$0xff]  ;;  %2651 = vmatprep.subr.bf16.mxu0 %v2650_v44  ;;  %2672 = vmatprep.subr.bf16.mxu1 %v2650_v44  ;;  %v2654_v59 = vpack.c.bf16 %v296_v49, %v294_v46  ;;  %v298_v60 = vadd.f32 %v270_v57, %v242_v52  ;;  %v243_v63 = vld [vmem:[%s4757_s0 + $0x90] sm:$0xff]  ;;  %v269_v0 = vld [vmem:[%s4758_s1 + $0x80] sm:$0xff] }
  0x1a   : > { %v300_v61 = vadd.f32 %v272_v58, %v244_v56  ;;  %v271_v1 = vld [vmem:[%s4758_s1 + $0x90] sm:$0xff]  ;;  %v246_v2 = vld [vmem:[%s4757_s0 + $0xa8] sm:$0xff]  ;;  %v248_v3 = vld [vmem:[%s4757_s0 + $0xb8] sm:$0xff]  ;;  %v2656_v6 = vpack.c.bf16 %v295_v55, %v293_v54  ;;  %v297_v8 = vadd.f32 %v269_v0, %v241_v62 }
  0x1b   : > { %v274_v4 = vld [vmem:[%s4758_s1 + $0xa8] sm:$0xff]  ;;  %v276_v5 = vld [vmem:[%s4758_s1 + $0xb8] sm:$0xff]  ;;  %v299_v9 = vadd.f32 %v271_v1, %v243_v63  ;;  %v245_v10 = vld [vmem:[%s4757_s0 + $0xa0] sm:$0xff] }
  0x1c   : > { %2653 = vmatpush1.bf16.msra.mxu0 %v2652_v53  ;;  %2679 = vmatpush1.bf16.msra.mxu1 %v2652_v53  ;;  %v247_v11 = vld [vmem:[%s4757_s0 + $0xb0] sm:$0xff]  ;;  %v2658_v12 = vpack.c.bf16 %v300_v61, %v298_v60  ;;  %v302_v13 = vadd.f32 %v274_v4, %v246_v2  ;;  %v304_v14 = vadd.f32 %v276_v5, %v248_v3  ;;  %v273_v15 = vld [vmem:[%s4758_s1 + $0xa0] sm:$0xff]  ;;  %v250_v17 = vld [vmem:[%s4757_s0 + $0xc8] sm:$0xff] }
  0x1d   : > { %2655 = vmatprep.subr.bf16.mxu0 %v2654_v59  ;;  %2673 = vmatprep.subr.bf16.mxu1 %v2654_v59  ;;  %v275_v16 = vld [vmem:[%s4758_s1 + $0xb0] sm:$0xff]  ;;  %v252_v18 = vld [vmem:[%s4757_s0 + $0xd8] sm:$0xff]  ;;  %v278_v19 = vld [vmem:[%s4758_s1 + $0xc8] sm:$0xff]  ;;  %v2660_v21 = vpack.c.bf16 %v299_v9, %v297_v8  ;;  %v301_v22 = vadd.f32 %v273_v15, %v245_v10 }
  0x1e   : > { %v280_v20 = vld [vmem:[%s4758_s1 + $0xd8] sm:$0xff]  ;;  %v303_v23 = vadd.f32 %v275_v16, %v247_v11  ;;  %v249_v24 = vld [vmem:[%s4757_s0 + $0xc0] sm:$0xff]  ;;  %v2662_v25 = vpack.c.bf16 %v304_v14, %v302_v13  ;;  %v306_v26 = vadd.f32 %v278_v19, %v250_v17  ;;  %v251_v28 = vld [vmem:[%s4757_s0 + $0xd0] sm:$0xff] }
  0x1f   : > { %v308_v27 = vadd.f32 %v280_v20, %v252_v18  ;;  %v277_v29 = vld [vmem:[%s4758_s1 + $0xc0] sm:$0xff]  ;;  %v279_v30 = vld [vmem:[%s4758_s1 + $0xd0] sm:$0xff]  ;;  %v330_v37 = vld [vmem:[%s3022_s10 + $0xa8] sm:$0xff] }
  0x20   : > { %2657 = vmatpush1.bf16.msra.mxu0 %v2656_v6  ;;  %2680 = vmatpush1.bf16.msra.mxu1 %v2656_v6  ;;  %v2664_v31 = vpack.c.bf16 %v303_v23, %v301_v22  ;;  %v305_v32 = vadd.f32 %v277_v29, %v249_v24  ;;  %v307_v33 = vadd.f32 %v279_v30, %v251_v28  ;;  %v309_v36 = vld [vmem:[%s3022_s10] sm:$0xff]  ;;  %v310_v38 = vld [vmem:[%s3022_s10 + $0x8] sm:$0xff]  ;;  %v331_v39 = vld [vmem:[%s3022_s10 + $0xb0] sm:$0xff] }
  0x21   : > { %2659 = vmatprep.subr.bf16.mxu0 %v2658_v12  ;;  %2674 = vmatprep.subr.bf16.mxu1 %v2658_v12  ;;  %v2666_v34 = vpack.c.bf16 %v308_v27, %v306_v26  ;;  %v311_v40 = vld [vmem:[%s3022_s10 + $0x10] sm:$0xff]  ;;  %v332_v41 = vld [vmem:[%s3022_s10 + $0xb8] sm:$0xff]  ;;  %v333_v43 = vld [vmem:[%s3022_s10 + $0xc0] sm:$0xff] }
  0x22   : > { %v2668_v35 = vpack.c.bf16 %v307_v33, %v305_v32  ;;  %v312_v42 = vld [vmem:[%s3022_s10 + $0x18] sm:$0xff]  ;;  %v313_v44 = vld [vmem:[%s3022_s10 + $0x20] sm:$0xff]  ;;  %v334_v45 = vld [vmem:[%s3022_s10 + $0xc8] sm:$0xff] }
  0x23   : > { %v314_v46 = vld [vmem:[%s3022_s10 + $0x28] sm:$0xff]  ;;  %v335_v47 = vld [vmem:[%s3022_s10 + $0xd0] sm:$0xff]  ;;  %v336_v49 = vld [vmem:[%s3022_s10 + $0xd8] sm:$0xff] }
  0x24   : > { %2661 = vmatpush1.bf16.msra.mxu0 %v2660_v21  ;;  %2681 = vmatpush1.bf16.msra.mxu1 %v2660_v21  ;;  %v315_v48 = vld [vmem:[%s3022_s10 + $0x30] sm:$0xff]  ;;  %v316_v50 = vld [vmem:[%s3022_s10 + $0x38] sm:$0xff]  ;;  %v337_v51 = vld [vmem:[%s3022_s10 + $0xe0] sm:$0xff] }
  0x25   : > { %2663 = vmatprep.subr.bf16.mxu0 %v2662_v25  ;;  %2675 = vmatprep.subr.bf16.mxu1 %v2662_v25  ;;  %v317_v52 = vld [vmem:[%s3022_s10 + $0x40] sm:$0xff]  ;;  %v338_v53 = vld [vmem:[%s3022_s10 + $0xe8] sm:$0xff]  ;;  %v339_v55 = vld [vmem:[%s3022_s10 + $0xf0] sm:$0xff] }
  0x26   : > { %v318_v54 = vld [vmem:[%s3022_s10 + $0x48] sm:$0xff]  ;;  %v319_v56 = vld [vmem:[%s3022_s10 + $0x50] sm:$0xff]  ;;  %v340_v57 = vld [vmem:[%s3022_s10 + $0xf8] sm:$0xff] }
  0x27   : > { %v320_v58 = vld [vmem:[%s3022_s10 + $0x58] sm:$0xff]  ;;  %v341_v59 = vld [vmem:[%s3022_s10 + $0x100] sm:$0xff]  ;;  %v342_v61 = vld [vmem:[%s3022_s10 + $0x108] sm:$0xff] }
  0x28   : > { %2665 = vmatpush1.bf16.msra.mxu0 %v2664_v31  ;;  %2682 = vmatpush1.bf16.msra.mxu1 %v2664_v31  ;;  %v321_v60 = vld [vmem:[%s3022_s10 + $0x60] sm:$0xff]  ;;  %v322_v62 = vld [vmem:[%s3022_s10 + $0x68] sm:$0xff]  ;;  %v343_v63 = vld [vmem:[%s3022_s10 + $0x110] sm:$0xff] }
  0x29   : > { %2667 = vmatprep.subr.bf16.mxu0 %v2666_v34  ;;  %2676 = vmatprep.subr.bf16.mxu1 %v2666_v34  ;;  %v323_v0 = vld [vmem:[%s3022_s10 + $0x70] sm:$0xff]  ;;  %v344_v1 = vld [vmem:[%s3022_s10 + $0x118] sm:$0xff]  ;;  %v345_v3 = vld [vmem:[%s3022_s10 + $0x120] sm:$0xff] }
  0x2a   : > { %v324_v2 = vld [vmem:[%s3022_s10 + $0x78] sm:$0xff]  ;;  %v325_v4 = vld [vmem:[%s3022_s10 + $0x80] sm:$0xff]  ;;  %v346_v5 = vld [vmem:[%s3022_s10 + $0x128] sm:$0xff] }
  0x2b   : > { %v326_v6 = vld [vmem:[%s3022_s10 + $0x88] sm:$0xff]  ;;  %v347_v8 = vld [vmem:[%s3022_s10 + $0x130] sm:$0xff]  ;;  %v348_v10 = vld [vmem:[%s3022_s10 + $0x138] sm:$0xff] }
  0x2c   : > { %2669 = vmatpush1.bf16.msra.mxu0 %v2668_v35  ;;  %2683 = vmatpush1.bf16.msra.mxu1 %v2668_v35  ;;  %v327_v9 = vld [vmem:[%s3022_s10 + $0x90] sm:$0xff]  ;;  %v328_v11 = vld [vmem:[%s3022_s10 + $0x98] sm:$0xff]  ;;  %v349_v12 = vld [vmem:[%s3022_s10 + $0x140] sm:$0xff] }
  0x2d   : > { %v329_v13 = vld [vmem:[%s3022_s10 + $0xa0] sm:$0xff]  ;;  %v350_v14 = vld [vmem:[%s3022_s10 + $0x148] sm:$0xff] }
  0x2f   : > { %2597 = vmatmul.mubr.msk.f32.vlgmr.msra.gmra.mrb[0].mxu0 %vm351_vm0, %v309_v36  ;;  %2618 = vmatmul.mubr.msk.f32.vlgmr.msra.gmra.mrb[0].mxu1 %vm351_vm0, %v330_v37 }
  0x30   : > { %548 = vmatprep.mubr.f32.mxu0 %v2799_v7  ;;  %674 = vmatprep.mubr.f32.mxu1 %v2799_v7 }
  0x33   : > { %2598 = vmatmul.mubr.msk.f32.gmra.mrb[2].mxu0 %vm351_vm0, %v310_v38  ;;  %2619 = vmatmul.mubr.msk.f32.gmra.mrb[2].mxu1 %vm351_vm0, %v331_v39 }
  0x34   : > { %554 = vmatprep.mubr.f32.mxu0 %v2799_v7  ;;  %680 = vmatprep.mubr.f32.mxu1 %v2799_v7 }
  0x37   : > { %2599 = vmatmul.mubr.msk.f32.gmra.mrb[4].mxu0 %vm351_vm0, %v311_v40  ;;  %2620 = vmatmul.mubr.msk.f32.gmra.mrb[4].mxu1 %vm351_vm0, %v332_v41 }
  0x38   : > { %560 = vmatprep.mubr.f32.mxu0 %v2799_v7  ;;  %686 = vmatprep.mubr.f32.mxu1 %v2799_v7 }
  0x3b   : > { %2600 = vmatmul.mubr.msk.f32.gmra.mrb[6].mxu0 %vm351_vm0, %v312_v42  ;;  %2621 = vmatmul.mubr.msk.f32.gmra.mrb[6].mxu1 %vm351_vm0, %v333_v43 }
  0x3c   : > { %566 = vmatprep.mubr.f32.mxu0 %v2799_v7  ;;  %692 = vmatprep.mubr.f32.mxu1 %v2799_v7 }
  0x3f   : > { %2601 = vmatmul.mubr.msk.f32.gmra.mrb[8].mxu0 %vm351_vm0, %v313_v44  ;;  %2622 = vmatmul.mubr.msk.f32.gmra.mrb[8].mxu1 %vm351_vm0, %v334_v45 }
  0x40   : > { %572 = vmatprep.mubr.f32.mxu0 %v2799_v7  ;;  %698 = vmatprep.mubr.f32.mxu1 %v2799_v7 }
  0x43   : > { %2602 = vmatmul.mubr.msk.f32.gmra.mrb[10].mxu0 %vm351_vm0, %v314_v46  ;;  %2623 = vmatmul.mubr.msk.f32.gmra.mrb[10].mxu1 %vm351_vm0, %v335_v47 }
  0x44   : > { %578 = vmatprep.mubr.f32.mxu0 %v2799_v7  ;;  %704 = vmatprep.mubr.f32.mxu1 %v2799_v7 }
  0x47   : > { %2603 = vmatmul.mubr.msk.f32.gmra.mrb[12].mxu0 %vm351_vm0, %v315_v48  ;;  %2624 = vmatmul.mubr.msk.f32.gmra.mrb[12].mxu1 %vm351_vm0, %v336_v49 }
  0x48   : > { %584 = vmatprep.mubr.f32.mxu0 %v2799_v7  ;;  %710 = vmatprep.mubr.f32.mxu1 %v2799_v7 }
  0x4b   : > { %2604 = vmatmul.mubr.msk.f32.gmra.mrb[14].mxu0 %vm351_vm0, %v316_v50  ;;  %2625 = vmatmul.mubr.msk.f32.gmra.mrb[14].mxu1 %vm351_vm0, %v337_v51 }
  0x4c   : > { %590 = vmatprep.mubr.f32.mxu0 %v2799_v7  ;;  %716 = vmatprep.mubr.f32.mxu1 %v2799_v7 }
  0x4f   : > { %2605 = vmatmul.mubr.msk.f32.gmra.mrb[16].mxu0 %vm351_vm0, %v317_v52  ;;  %2626 = vmatmul.mubr.msk.f32.gmra.mrb[16].mxu1 %vm351_vm0, %v338_v53 }
  0x50   : > { %596 = vmatprep.mubr.f32.mxu0 %v2799_v7  ;;  %722 = vmatprep.mubr.f32.mxu1 %v2799_v7 }
  0x53   : > { %2606 = vmatmul.mubr.msk.f32.gmra.mrb[18].mxu0 %vm351_vm0, %v318_v54  ;;  %2627 = vmatmul.mubr.msk.f32.gmra.mrb[18].mxu1 %vm351_vm0, %v339_v55 }
  0x54   : > { %602 = vmatprep.mubr.f32.mxu0 %v2799_v7  ;;  %728 = vmatprep.mubr.f32.mxu1 %v2799_v7 }
  0x57   : > { %2607 = vmatmul.mubr.msk.f32.gmra.mrb[20].mxu0 %vm351_vm0, %v319_v56  ;;  %2628 = vmatmul.mubr.msk.f32.gmra.mrb[20].mxu1 %vm351_vm0, %v340_v57 }
  0x58   : > { %608 = vmatprep.mubr.f32.mxu0 %v2799_v7  ;;  %734 = vmatprep.mubr.f32.mxu1 %v2799_v7 }
  0x5b   : > { %2608 = vmatmul.mubr.msk.f32.gmra.mrb[22].mxu0 %vm351_vm0, %v320_v58  ;;  %2629 = vmatmul.mubr.msk.f32.gmra.mrb[22].mxu1 %vm351_vm0, %v341_v59 }
  0x5c   : > { %614 = vmatprep.mubr.f32.mxu0 %v2799_v7  ;;  %740 = vmatprep.mubr.f32.mxu1 %v2799_v7 }
  0x5f   : > { %2609 = vmatmul.mubr.msk.f32.gmra.mrb[24].mxu0 %vm351_vm0, %v321_v60  ;;  %2630 = vmatmul.mubr.msk.f32.gmra.mrb[24].mxu1 %vm351_vm0, %v342_v61 }
  0x60   : > { %620 = vmatprep.mubr.f32.mxu0 %v2799_v7  ;;  %746 = vmatprep.mubr.f32.mxu1 %v2799_v7 }
  0x63   : > { %2610 = vmatmul.mubr.msk.f32.gmra.mrb[26].mxu0 %vm351_vm0, %v322_v62  ;;  %2631 = vmatmul.mubr.msk.f32.gmra.mrb[26].mxu1 %vm351_vm0, %v343_v63 }
  0x64   : > { %626 = vmatprep.mubr.f32.mxu0 %v2799_v7  ;;  %752 = vmatprep.mubr.f32.mxu1 %v2799_v7 }
  0x67   : > { %2611 = vmatmul.mubr.msk.f32.gmra.mrb[28].mxu0 %vm351_vm0, %v323_v0  ;;  %2632 = vmatmul.mubr.msk.f32.gmra.mrb[28].mxu1 %vm351_vm0, %v344_v1 }
  0x68   : > { %632 = vmatprep.mubr.f32.mxu0 %v2799_v7  ;;  %758 = vmatprep.mubr.f32.mxu1 %v2799_v7 }
  0x6b   : > { %2612 = vmatmul.mubr.msk.f32.gmra.mrb[30].mxu0 %vm351_vm0, %v324_v2  ;;  %2633 = vmatmul.mubr.msk.f32.gmra.mrb[30].mxu1 %vm351_vm0, %v345_v3 }
  0x6c   : > { %638 = vmatprep.mubr.f32.mxu0 %v2799_v7  ;;  %764 = vmatprep.mubr.f32.mxu1 %v2799_v7 }
  0x6f   : > { %2613 = vmatmul.mubr.msk.f32.gmra.mrb[32].mxu0 %vm351_vm0, %v325_v4  ;;  %2634 = vmatmul.mubr.msk.f32.gmra.mrb[32].mxu1 %vm351_vm0, %v346_v5 }
  0x70   : > { %644 = vmatprep.mubr.f32.mxu0 %v2799_v7  ;;  %770 = vmatprep.mubr.f32.mxu1 %v2799_v7 }
  0x73   : > { %2614 = vmatmul.mubr.msk.f32.gmra.mrb[34].mxu0 %vm351_vm0, %v326_v6  ;;  %2635 = vmatmul.mubr.msk.f32.gmra.mrb[34].mxu1 %vm351_vm0, %v347_v8 }
  0x74   : > { %650 = vmatprep.mubr.f32.mxu0 %v2799_v7  ;;  %776 = vmatprep.mubr.f32.mxu1 %v2799_v7 }
  0x77   : > { %2615 = vmatmul.mubr.msk.f32.gmra.mrb[36].mxu0 %vm351_vm0, %v327_v9  ;;  %2636 = vmatmul.mubr.msk.f32.gmra.mrb[36].mxu1 %vm351_vm0, %v348_v10 }
  0x78   : > { %656 = vmatprep.mubr.f32.mxu0 %v2799_v7  ;;  %782 = vmatprep.mubr.f32.mxu1 %v2799_v7 }
  0x7b   : > { %2616 = vmatmul.mubr.msk.f32.gmra.mrb[38].mxu0 %vm351_vm0, %v328_v11  ;;  %2637 = vmatmul.mubr.msk.f32.gmra.mrb[38].mxu1 %vm351_vm0, %v349_v12 }
  0x7c   : > { %662 = vmatprep.mubr.f32.mxu0 %v2799_v7  ;;  %788 = vmatprep.mubr.f32.mxu1 %v2799_v7 }
  0x7f   : > { %2617 = vmatmul.mubr.msk.f32.gmra.mrb[40].mxu0 %vm351_vm0, %v329_v13  ;;  %2638 = vmatmul.mubr.msk.f32.gmra.mrb[40].mxu1 %vm351_vm0, %v350_v14 }
 0x102   : > { %v3148_v15 = vpop.f32.mrb[0].mxu0  ;;  %v3150_v16 = vpop.f32.mrb[0].mxu1 }
 0x103   : > { %4849 = vst [vmem:[#allocation2_spill] sm:$0xff] %v3148_v15  ;;  %4850 = vst [vmem:[#allocation3_spill] sm:$0xff] %v3150_v16  ;;  %v3152_v17 = vpop.f32.mrb[1].mxu0  ;;  %v3154_v18 = vpop.f32.mrb[1].mxu1  ;;  %v1006_v24 = vmul.f32 %v3150_v16, %v3150_v16  ;;  %v964_v25 = vmul.f32 %v3148_v15, %v3148_v15 }
 0x104   : > { %4851 = vst [vmem:[#allocation4_spill] sm:$0xff] %v3152_v17  ;;  %4852 = vst [vmem:[#allocation5_spill] sm:$0xff] %v3154_v18  ;;  %v965_v19 = vmul.f32 %v3152_v17, %v3152_v17  ;;  %v1007_v7 = vmul.f32 %v3154_v18, %v3154_v18  ;;  %v880_v20 = vsel %vm795_vm1, %v3154_v18, 0.0  ;;  %v796_v21 = vsel %vm795_vm1, %v3152_v17, 0.0 }
 0x105   : > { %v881_v22 = vadd.f32 %v880_v20, %v3150_v16  ;;  %v797_v23 = vadd.f32 %v796_v21, %v3148_v15 }
 0x106   : > { %v3170_v26 = vpop.f32.mrb[2].mxu0  ;;  %v1132_v27 = vsel %vm795_vm1, %v1007_v7, 0.0  ;;  %v1048_v28 = vsel %vm795_vm1, %v965_v19, 0.0  ;;  %v3174_v29 = vpop.f32.mrb[2].mxu1 }
 0x107   : > { %4853 = vst [vmem:[#allocation6_spill] sm:$0xff] %v3170_v26  ;;  %4854 = vst [vmem:[#allocation7_spill] sm:$0xff] %v3174_v29  ;;  %882 = vadd.xlane.f32.xlu1 %v881_v22  ;;  %798 = vadd.xlane.f32.xlu0 %v797_v23  ;;  %v3176_v30 = vpop.f32.mrb[3].mxu0  ;;  %v1133_v31 = vadd.f32 %v1132_v27, %v1006_v24  ;;  %v1049_v32 = vadd.f32 %v1048_v28, %v964_v25  ;;  %v3178_v33 = vpop.f32.mrb[3].mxu1 }
 0x108   : > { %4855 = vst [vmem:[#allocation8_spill] sm:$0xff] %v3176_v30  ;;  %4856 = vst [vmem:[#allocation9_spill] sm:$0xff] %v3178_v33  ;;  %v966_v34 = vmul.f32 %v3170_v26, %v3170_v26  ;;  %v967_v35 = vmul.f32 %v3176_v30, %v3176_v30  ;;  %v1009_v36 = vmul.f32 %v3178_v33, %v3178_v33  ;;  %v800_v37 = vsel %vm795_vm1, %v3176_v30, 0.0 }
 0x109   : > { %v884_v38 = vsel %vm795_vm1, %v3178_v33, 0.0  ;;  %v801_v39 = vadd.f32 %v800_v37, %v3170_v26  ;;  %v1008_v41 = vmul.f32 %v3174_v29, %v3174_v29 }
 0x10a   : > { %v885_v40 = vadd.f32 %v884_v38, %v3174_v29  ;;  %v3194_v42 = vpop.f32.mrb[4].mxu0  ;;  %v1052_v43 = vsel %vm795_vm1, %v967_v35, 0.0  ;;  %v3197_v44 = vpop.f32.mrb[4].mxu1  ;;  %v1136_v45 = vsel %vm795_vm1, %v1009_v36, 0.0 }
 0x10b   : > { %4857 = vst [vmem:[#allocation10_spill] sm:$0xff] %v3194_v42  ;;  %4858 = vst [vmem:[#allocation11_spill] sm:$0xff] %v3197_v44  ;;  %1134 = vadd.xlane.f32.xlu1 %v1133_v31  ;;  %1050 = vadd.xlane.f32.xlu0 %v1049_v32  ;;  %v3200_v46 = vpop.f32.mrb[5].mxu0  ;;  %v1053_v47 = vadd.f32 %v1052_v43, %v966_v34  ;;  %v3202_v48 = vpop.f32.mrb[5].mxu1  ;;  %v1137_v49 = vadd.f32 %v1136_v45, %v1008_v41 }
 0x10c   : > { %4859 = vst [vmem:[#allocation12_spill] sm:$0xff] %v3200_v46  ;;  %4860 = vst [vmem:[#allocation13_spill] sm:$0xff] %v3202_v48  ;;  %v968_v50 = vmul.f32 %v3194_v42, %v3194_v42  ;;  %v969_v51 = vmul.f32 %v3200_v46, %v3200_v46  ;;  %v1011_v52 = vmul.f32 %v3202_v48, %v3202_v48  ;;  %v804_v53 = vsel %vm795_vm1, %v3200_v46, 0.0 }
 0x10d   : > { %v888_v54 = vsel %vm795_vm1, %v3202_v48, 0.0  ;;  %v805_v55 = vadd.f32 %v804_v53, %v3194_v42  ;;  %v1010_v57 = vmul.f32 %v3197_v44, %v3197_v44 }
 0x10e   : > { %v889_v56 = vadd.f32 %v888_v54, %v3197_v44  ;;  %v3218_v58 = vpop.f32.mrb[6].mxu0  ;;  %v3220_v59 = vpop.f32.mrb[6].mxu1  ;;  %v1056_v60 = vsel %vm795_vm1, %v969_v51, 0.0  ;;  %v1140_v61 = vsel %vm795_vm1, %v1011_v52, 0.0 }
 0x10f   : > { %4861 = vst [vmem:[#allocation14_spill] sm:$0xff] %v3218_v58  ;;  %4862 = vst [vmem:[#allocation15_spill] sm:$0xff] %v3220_v59  ;;  %1054 = vadd.xlane.f32.xlu1 %v1053_v47  ;;  %802 = vadd.xlane.f32.xlu0 %v801_v39  ;;  %v3224_v62 = vpop.f32.mrb[7].mxu0  ;;  %v3226_v63 = vpop.f32.mrb[7].mxu1  ;;  %v1057_v0 = vadd.f32 %v1056_v60, %v968_v50  ;;  %v1141_v1 = vadd.f32 %v1140_v61, %v1010_v57 }
 0x110   : > { %4863 = vst [vmem:[#allocation16_spill] sm:$0xff] %v3224_v62  ;;  %4864 = vst [vmem:[#allocation17_spill] sm:$0xff] %v3226_v63  ;;  %v1012_v2 = vmul.f32 %v3220_v59, %v3220_v59  ;;  %v971_v3 = vmul.f32 %v3224_v62, %v3224_v62  ;;  %v1013_v4 = vmul.f32 %v3226_v63, %v3226_v63  ;;  %v892_v5 = vsel %vm795_vm1, %v3226_v63, 0.0 }
 0x111   : > { %v808_v6 = vsel %vm795_vm1, %v3224_v62, 0.0  ;;  %v893_v8 = vadd.f32 %v892_v5, %v3220_v59  ;;  %v970_v10 = vmul.f32 %v3218_v58, %v3218_v58 }
 0x112   : > { %v809_v9 = vadd.f32 %v808_v6, %v3218_v58  ;;  %v3242_v11 = vpop.f32.mrb[8].mxu0  ;;  %v3244_v12 = vpop.f32.mrb[8].mxu1  ;;  %v1144_v13 = vsel %vm795_vm1, %v1013_v4, 0.0  ;;  %v1060_v14 = vsel %vm795_vm1, %v971_v3, 0.0 }
 0x113   : > { %4865 = vst [vmem:[#allocation18_spill] sm:$0xff] %v3242_v11  ;;  %4866 = vst [vmem:[#allocation19_spill] sm:$0xff] %v3244_v12  ;;  %886 = vadd.xlane.f32.xlu0 %v885_v40  ;;  %806 = vadd.xlane.f32.xlu1 %v805_v55  ;;  %v3248_v19 = vpop.f32.mrb[9].mxu0  ;;  %v3250_v7 = vpop.f32.mrb[9].mxu1  ;;  %v3252_v20 = vadd.f32 %v1144_v13, %v1012_v2  ;;  %v3254_v21 = vadd.f32 %v1060_v14, %v970_v10 }
 0x114   : > { %4867 = vst [vmem:[#allocation20_spill] sm:$0xff] %v3248_v19  ;;  %4868 = vst [vmem:[#allocation21_spill] sm:$0xff] %v3250_v7  ;;  %v1014_v22 = vmul.f32 %v3244_v12, %v3244_v12  ;;  %v973_v23 = vmul.f32 %v3248_v19, %v3248_v19  ;;  %v1015_v24 = vmul.f32 %v3250_v7, %v3250_v7  ;;  %v896_v25 = vsel %vm795_vm1, %v3250_v7, 0.0 }
 0x115   : > { %v812_v27 = vsel %vm795_vm1, %v3248_v19, 0.0  ;;  %v3267_v28 = vadd.f32 %v896_v25, %v3244_v12  ;;  %v972_v32 = vmul.f32 %v3242_v11, %v3242_v11 }
 0x116   : > { %v3270_v31 = vadd.f32 %v812_v27, %v3242_v11  ;;  %v3274_v34 = vpop.f32.mrb[10].mxu0  ;;  %v3276_v35 = vpop.f32.mrb[10].mxu1  ;;  %v1148_v36 = vsel %vm795_vm1, %v1015_v24, 0.0  ;;  %v1064_v37 = vsel %vm795_vm1, %v973_v23, 0.0 }
 0x117   : > { %4869 = vst [vmem:[#allocation22_spill] sm:$0xff] %v3274_v34  ;;  %4870 = vst [vmem:[#allocation23_spill] sm:$0xff] %v3276_v35  ;;  %1138 = vadd.xlane.f32.xlu0 %v1137_v49  ;;  %890 = vadd.xlane.f32.xlu1 %v889_v56  ;;  %v3280_v38 = vpop.f32.mrb[11].mxu0  ;;  %v3282_v39 = vpop.f32.mrb[11].mxu1  ;;  %v3284_v40 = vadd.f32 %v1148_v36, %v1014_v22  ;;  %v3286_v41 = vadd.f32 %v1064_v37, %v972_v32 }
 0x118   : > { %4871 = vst [vmem:[#allocation24_spill] sm:$0xff] %v3280_v38  ;;  %4872 = vst [vmem:[#allocation25_spill] sm:$0xff] %v3282_v39  ;;  %v1016_v43 = vmul.f32 %v3276_v35, %v3276_v35  ;;  %v975_v45 = vmul.f32 %v3280_v38, %v3280_v38  ;;  %v1017_v47 = vmul.f32 %v3282_v39, %v3282_v39  ;;  %v900_v49 = vsel %vm795_vm1, %v3282_v39, 0.0 }
 0x119   : > { %v816_v50 = vsel %vm795_vm1, %v3280_v38, 0.0  ;;  %v3299_v51 = vadd.f32 %v900_v49, %v3276_v35  ;;  %v974_v53 = vmul.f32 %v3274_v34, %v3274_v34 }
 0x11a   : > { %v3302_v52 = vadd.f32 %v816_v50, %v3274_v34  ;;  %v3306_v54 = vpop.f32.mrb[12].mxu0  ;;  %v3308_v55 = vpop.f32.mrb[12].mxu1  ;;  %v1152_v56 = vsel %vm795_vm1, %v1017_v47, 0.0  ;;  %v1068_v57 = vsel %vm795_vm1, %v975_v45, 0.0 }
 0x11b   : > { %4873 = vst [vmem:[#allocation26_spill] sm:$0xff] %v3306_v54  ;;  %4874 = vst [vmem:[#allocation27_spill] sm:$0xff] %v3308_v55  ;;  %1058 = vadd.xlane.f32.xlu0 %v1057_v0  ;;  %1142 = vadd.xlane.f32.xlu1 %v1141_v1  ;;  %v3312_v60 = vpop.f32.mrb[13].mxu0  ;;  %v3314_v61 = vpop.f32.mrb[13].mxu1  ;;  %v3316_v2 = vadd.f32 %v1152_v56, %v1016_v43  ;;  %v3318_v3 = vadd.f32 %v1068_v57, %v974_v53 }
 0x11c   : > { %4875 = vst [vmem:[#allocation28_spill] sm:$0xff] %v3312_v60  ;;  %4876 = vst [vmem:[#allocation29_spill] sm:$0xff] %v3314_v61  ;;  %v1018_v4 = vmul.f32 %v3308_v55, %v3308_v55  ;;  %v977_v5 = vmul.f32 %v3312_v60, %v3312_v60  ;;  %v1019_v6 = vmul.f32 %v3314_v61, %v3314_v61  ;;  %v904_v0 = vsel %vm795_vm1, %v3314_v61, 0.0 }
 0x11d   : > { %v820_v1 = vsel %vm795_vm1, %v3312_v60, 0.0  ;;  %v3331_v10 = vadd.f32 %v904_v0, %v3308_v55  ;;  %v976_v14 = vmul.f32 %v3306_v54, %v3306_v54 }
 0x11e   : > { %v3334_v13 = vadd.f32 %v820_v1, %v3306_v54  ;;  %v3338_v22 = vpop.f32.mrb[14].mxu0  ;;  %v3340_v23 = vpop.f32.mrb[14].mxu1  ;;  %v1156_v24 = vsel %vm795_vm1, %v1019_v6, 0.0  ;;  %v1072_v25 = vsel %vm795_vm1, %v977_v5, 0.0 }
 0x11f   : > { %4877 = vst [vmem:[#allocation30_spill] sm:$0xff] %v3340_v23  ;;  %894 = vadd.xlane.f32.xlu0 %v893_v8  ;;  %810 = vadd.xlane.f32.xlu1 %v809_v9  ;;  %v3344_v27 = vpop.f32.mrb[15].mxu0  ;;  %v3346_v32 = vpop.f32.mrb[15].mxu1  ;;  %v3348_v36 = vadd.f32 %v1156_v24, %v1018_v4  ;;  %v3350_v37 = vadd.f32 %v1072_v25, %v976_v14 }
 0x120   : > { %4878 = vst [vmem:[#allocation31_spill] sm:$0xff] %v3346_v32  ;;  %v1020_v43 = vmul.f32 %v3340_v23, %v3340_v23  ;;  %v979_v45 = vmul.f32 %v3344_v27, %v3344_v27  ;;  %v1021_v47 = vmul.f32 %v3346_v32, %v3346_v32  ;;  %v908_v8 = vsel %vm795_vm1, %v3346_v32, 0.0 }
 0x121   : > { %v824_v9 = vsel %vm795_vm1, %v3344_v27, 0.0  ;;  %v3363_v49 = vadd.f32 %v908_v8, %v3340_v23  ;;  %v978_v53 = vmul.f32 %v3338_v22, %v3338_v22 }
 0x122   : > { %v3366_v50 = vadd.f32 %v824_v9, %v3338_v22  ;;  %v3370_v56 = vpop.f32.mrb[16].mxu0  ;;  %v3372_v57 = vpop.f32.mrb[16].mxu1  ;;  %v1160_v4 = vsel %vm795_vm1, %v1021_v47, 0.0  ;;  %v1076_v5 = vsel %vm795_vm1, %v979_v45, 0.0 }
 0x123   : > { %1146 = vadd.xlane.f32.xlu0 %v3252_v20  ;;  %1062 = vadd.xlane.f32.xlu1 %v3254_v21  ;;  %v3378_v6 = vpop.f32.mrb[17].mxu0  ;;  %v3380_v0 = vpop.f32.mrb[17].mxu1  ;;  %v3382_v1 = vadd.f32 %v1160_v4, %v1020_v43  ;;  %v3384_v14 = vadd.f32 %v1076_v5, %v978_v53  ;;  %v1022_v24 = vmul.f32 %v3372_v57, %v3372_v57 }
 0x124   : > { %v981_v25 = vmul.f32 %v3378_v6, %v3378_v6  ;;  %v1023_v45 = vmul.f32 %v3380_v0, %v3380_v0  ;;  %v912_v20 = vsel %vm795_vm1, %v3380_v0, 0.0  ;;  %v828_v21 = vsel %vm795_vm1, %v3378_v6, 0.0 }
 0x125   : > { %v3397_v43 = vadd.f32 %v912_v20, %v3372_v57  ;;  %v3400_v47 = vadd.f32 %v828_v21, %v3370_v56  ;;  %v980_v8 = vmul.f32 %v3370_v56, %v3370_v56 }
 0x126   : > { %v3404_v9 = vpop.f32.mrb[18].mxu0  ;;  %v3406_v53 = vpop.f32.mrb[18].mxu1  ;;  %v1164_v4 = vsel %vm795_vm1, %v1023_v45, 0.0  ;;  %v1080_v5 = vsel %vm795_vm1, %v981_v25, 0.0 }
 0x127   : > { %898 = vadd.xlane.f32.xlu1 %v3267_v28  ;;  %814 = vadd.xlane.f32.xlu0 %v3270_v31  ;;  %v3412_v20 = vpop.f32.mrb[19].mxu0  ;;  %v3414_v61 = vpop.f32.mrb[19].mxu1  ;;  %v3416_v21 = vadd.f32 %v1164_v4, %v1022_v24  ;;  %v3418_v55 = vadd.f32 %v1080_v5, %v980_v8  ;;  %v1024_v38 = vmul.f32 %v3406_v53, %v3406_v53 }
 0x128   : > { %v983_v45 = vmul.f32 %v3412_v20, %v3412_v20  ;;  %v1025_v25 = vmul.f32 %v3414_v61, %v3414_v61  ;;  %v916_v28 = vsel %vm795_vm1, %v3414_v61, 0.0  ;;  %v832_v31 = vsel %vm795_vm1, %v3412_v20, 0.0 }
 0x129   : > { %v3431_v24 = vadd.f32 %v916_v28, %v3406_v53  ;;  %v3434_v8 = vadd.f32 %v832_v31, %v3404_v9  ;;  %v982_v4 = vmul.f32 %v3404_v9, %v3404_v9 }
 0x12a   : > { %v3438_v5 = vpop.f32.mrb[20].mxu0  ;;  %v3440_v34 = vpop.f32.mrb[20].mxu1  ;;  %v1168_v32 = vsel %vm795_vm1, %v1025_v25, 0.0  ;;  %v1084_v23 = vsel %vm795_vm1, %v983_v45, 0.0 }
 0x12b   : > { %4879 = vst [vmem:[#allocation32_spill] sm:$0xff] %v3438_v5  ;;  %4880 = vst [vmem:[#allocation33_spill] sm:$0xff] %v3440_v34  ;;  %1150 = vadd.xlane.f32.xlu1 %v3284_v40  ;;  %1066 = vadd.xlane.f32.xlu0 %v3286_v41  ;;  %v3446_v28 = vpop.f32.mrb[21].mxu0  ;;  %v3448_v7 = vpop.f32.mrb[21].mxu1  ;;  %v3450_v31 = vadd.f32 %v1168_v32, %v1024_v38  ;;  %v3452_v12 = vadd.f32 %v1084_v23, %v982_v4 }
 0x12c   : > { %4881 = vst [vmem:[#allocation34_spill] sm:$0xff] %v3446_v28  ;;  %4882 = vst [vmem:[#allocation35_spill] sm:$0xff] %v3448_v7  ;;  %v1026_v60 = vmul.f32 %v3440_v34, %v3440_v34  ;;  %v985_v25 = vmul.f32 %v3446_v28, %v3446_v28  ;;  %v1027_v45 = vmul.f32 %v3448_v7, %v3448_v7  ;;  %v920_v40 = vsel %vm795_vm1, %v3448_v7, 0.0 }
 0x12d   : > { %v836_v41 = vsel %vm795_vm1, %v3446_v28, 0.0  ;;  %v3465_v38 = vadd.f32 %v920_v40, %v3440_v34  ;;  %v984_v32 = vmul.f32 %v3438_v5, %v3438_v5 }
 0x12e   : > { %v3468_v23 = vadd.f32 %v836_v41, %v3438_v5  ;;  %v3472_v4 = vpop.f32.mrb[22].mxu0  ;;  %v3474_v54 = vpop.f32.mrb[22].mxu1  ;;  %v1172_v62 = vsel %vm795_vm1, %v1027_v45, 0.0  ;;  %v1088_v58 = vsel %vm795_vm1, %v985_v25, 0.0 }
 0x12f   : > { %4883 = vst [vmem:[#allocation36_spill] sm:$0xff] %v3472_v4  ;;  %4884 = vst [vmem:[#allocation37_spill] sm:$0xff] %v3474_v54  ;;  %902 = vadd.xlane.f32.xlu0 %v3299_v51  ;;  %818 = vadd.xlane.f32.xlu1 %v3302_v52  ;;  %v3480_v40 = vpop.f32.mrb[23].mxu0  ;;  %v3482_v39 = vpop.f32.mrb[23].mxu1  ;;  %v3484_v41 = vadd.f32 %v1172_v62, %v1026_v60  ;;  %v3486_v35 = vadd.f32 %v1088_v58, %v984_v32 }
 0x130   : > { %4885 = vst [vmem:[#allocation38_spill] sm:$0xff] %v3480_v40  ;;  %4886 = vst [vmem:[#allocation39_spill] sm:$0xff] %v3482_v39  ;;  %v1028_v48 = vmul.f32 %v3474_v54, %v3474_v54  ;;  %v987_v45 = vmul.f32 %v3480_v40, %v3480_v40  ;;  %v1029_v25 = vmul.f32 %v3482_v39, %v3482_v39  ;;  %v924_v51 = vsel %vm795_vm1, %v3482_v39, 0.0 }
 0x131   : > { %v840_v52 = vsel %vm795_vm1, %v3480_v40, 0.0  ;;  %v3499_v62 = vadd.f32 %v924_v51, %v3474_v54  ;;  %v986_v60 = vmul.f32 %v3472_v4, %v3472_v4 }
 0x132   : > { %v3502_v58 = vadd.f32 %v840_v52, %v3472_v4  ;;  %v3506_v32 = vpop.f32.mrb[24].mxu0  ;;  %v3508_v44 = vpop.f32.mrb[24].mxu1  ;;  %v1176_v19 = vsel %vm795_vm1, %v1029_v25, 0.0  ;;  %v1092_v11 = vsel %vm795_vm1, %v987_v45, 0.0 }
 0x133   : > { %4887 = vst [vmem:[#allocation40_spill] sm:$0xff] %v3506_v32  ;;  %4888 = vst [vmem:[#allocation41_spill] sm:$0xff] %v3508_v44  ;;  %1154 = vadd.xlane.f32.xlu0 %v3316_v2  ;;  %1070 = vadd.xlane.f32.xlu1 %v3318_v3  ;;  %v3514_v51 = vpop.f32.mrb[25].mxu0  ;;  %v3516_v46 = vpop.f32.mrb[25].mxu1  ;;  %v3518_v52 = vadd.f32 %v1176_v19, %v1028_v48  ;;  %v3520_v42 = vadd.f32 %v1092_v11, %v986_v60 }
 0x134   : > { %4889 = vst [vmem:[#allocation42_spill] sm:$0xff] %v3514_v51  ;;  %4890 = vst [vmem:[#allocation43_spill] sm:$0xff] %v3516_v46  ;;  %v1030_v63 = vmul.f32 %v3508_v44, %v3508_v44  ;;  %v989_v25 = vmul.f32 %v3514_v51, %v3514_v51  ;;  %v1031_v45 = vmul.f32 %v3516_v46, %v3516_v46  ;;  %v928_v2 = vsel %vm795_vm1, %v3516_v46, 0.0 }
 0x135   : > { %v844_v3 = vsel %vm795_vm1, %v3514_v51, 0.0  ;;  %v3533_v48 = vadd.f32 %v928_v2, %v3508_v44  ;;  %v988_v19 = vmul.f32 %v3506_v32, %v3506_v32 }
 0x136   : > { %v3536_v11 = vadd.f32 %v844_v3, %v3506_v32  ;;  %v3540_v60 = vpop.f32.mrb[26].mxu0  ;;  %v3542_v59 = vpop.f32.mrb[26].mxu1  ;;  %v1180_v18 = vsel %vm795_vm1, %v1031_v45, 0.0  ;;  %v1096_v16 = vsel %vm795_vm1, %v989_v25, 0.0  ;;  %v2800_v32 = vmov 0  }
 0x137   : > { %4891 = vst [vmem:[#allocation44_spill] sm:$0xff] %v3540_v60  ;;  %4892 = vst [vmem:[#allocation45_spill] sm:$0xff] %v3542_v59  ;;  %906 = vadd.xlane.f32.xlu1 %v3331_v10  ;;  %822 = vadd.xlane.f32.xlu0 %v3334_v13  ;;  %v3548_v2 = vpop.f32.mrb[27].mxu0  ;;  %v3550_v33 = vpop.f32.mrb[27].mxu1  ;;  %v3552_v3 = vadd.f32 %v1180_v18, %v1030_v63  ;;  %v3554_v29 = vadd.f32 %v1096_v16, %v988_v19 }
 0x138   : > { %4893 = vst [vmem:[#allocation46_spill] sm:$0xff] %v3548_v2  ;;  %4894 = vst [vmem:[#allocation47_spill] sm:$0xff] %v3550_v33  ;;  %v1032_v17 = vmul.f32 %v3542_v59, %v3542_v59  ;;  %v991_v45 = vmul.f32 %v3548_v2, %v3548_v2  ;;  %v1033_v25 = vmul.f32 %v3550_v33, %v3550_v33  ;;  %v932_v10 = vsel %vm795_vm1, %v3550_v33, 0.0 }
 0x139   : > { %v848_v13 = vsel %vm795_vm1, %v3548_v2, 0.0  ;;  %v3567_v18 = vadd.f32 %v932_v10, %v3542_v59  ;;  %v990_v63 = vmul.f32 %v3540_v60, %v3540_v60  ;;  %2697 = vset.pattern.permute.xlu1 %v2800_v32  ;;  %2696 = vset.pattern.permute.xlu0 %v2800_v32 }
 0x13a   : > { %v3570_v16 = vadd.f32 %v848_v13, %v3540_v60  ;;  %v3574_v19 = vpop.f32.mrb[28].mxu0  ;;  %v3576_v15 = vpop.f32.mrb[28].mxu1  ;;  %v1184_v30 = vsel %vm795_vm1, %v1033_v25, 0.0  ;;  %v1100_v26 = vsel %vm795_vm1, %v991_v45, 0.0 }
 0x13b   : > { %4895 = vst [vmem:[#allocation48_spill] sm:$0xff] %v3574_v19  ;;  %4896 = vst [vmem:[#allocation49_spill] sm:$0xff] %v3576_v15  ;;  %1158 = vadd.xlane.f32.xlu1 %v3348_v36  ;;  %1074 = vadd.xlane.f32.xlu0 %v3350_v37  ;;  %v3582_v10 = vpop.f32.mrb[29].mxu0  ;;  %v3584_v33 = vpop.f32.mrb[29].mxu1  ;;  %v3586_v13 = vadd.f32 %v1184_v30, %v1032_v17  ;;  %v3588_v59 = vadd.f32 %v1100_v26, %v990_v63 }
 0x13c   : > { %4897 = vst [vmem:[#allocation50_spill] sm:$0xff] %v3582_v10  ;;  %4898 = vst [vmem:[#allocation51_spill] sm:$0xff] %v3584_v33  ;;  %v1034_v2 = vmul.f32 %v3576_v15, %v3576_v15  ;;  %v993_v25 = vmul.f32 %v3582_v10, %v3582_v10  ;;  %v1035_v45 = vmul.f32 %v3584_v33, %v3584_v33  ;;  %v936_v36 = vsel %vm795_vm1, %v3584_v33, 0.0 }
 0x13d   : > { %v852_v37 = vsel %vm795_vm1, %v3582_v10, 0.0  ;;  %v3601_v17 = vadd.f32 %v936_v36, %v3576_v15  ;;  %v992_v30 = vmul.f32 %v3574_v19, %v3574_v19 }
 0x13e   : > { %v3604_v26 = vadd.f32 %v852_v37, %v3574_v19  ;;  %v3608_v63 = vpop.f32.mrb[30].mxu0  ;;  %v3610_v60 = vpop.f32.mrb[30].mxu1  ;;  %v1188_v51 = vsel %vm795_vm1, %v1035_v45, 0.0  ;;  %v1104_v33 = vsel %vm795_vm1, %v993_v25, 0.0 }
 0x13f   : > { %4899 = vst [vmem:[#allocation52_spill] sm:$0xff] %v3608_v63  ;;  %4900 = vst [vmem:[#allocation53_spill] sm:$0xff] %v3610_v60  ;;  %910 = vadd.xlane.f32.xlu0 %v3363_v49  ;;  %826 = vadd.xlane.f32.xlu1 %v3366_v50  ;;  %v3616_v36 = vpop.f32.mrb[31].mxu0  ;;  %v3618_v10 = vpop.f32.mrb[31].mxu1  ;;  %v3620_v37 = vadd.f32 %v1188_v51, %v1034_v2  ;;  %v3622_v15 = vadd.f32 %v1104_v33, %v992_v30 }
 0x140   : > { %4901 = vst [vmem:[#allocation54_spill] sm:$0xff] %v3616_v36  ;;  %4902 = vst [vmem:[#allocation55_spill] sm:$0xff] %v3618_v10  ;;  %v1036_v19 = vmul.f32 %v3610_v60, %v3610_v60  ;;  %v995_v45 = vmul.f32 %v3616_v36, %v3616_v36  ;;  %v1037_v25 = vmul.f32 %v3618_v10, %v3618_v10  ;;  %v940_v49 = vsel %vm795_vm1, %v3618_v10, 0.0 }
 0x141   : > { %v856_v50 = vsel %vm795_vm1, %v3616_v36, 0.0  ;;  %v3635_v33 = vadd.f32 %v940_v49, %v3610_v60  ;;  %v994_v2 = vmul.f32 %v3608_v63, %v3608_v63 }
 0x142   : > { %v3638_v51 = vadd.f32 %v856_v50, %v3608_v63  ;;  %v3642_v30 = vpop.f32.mrb[32].mxu0  ;;  %v3644_v46 = vpop.f32.mrb[32].mxu1  ;;  %v1192_v10 = vsel %vm795_vm1, %v1037_v25, 0.0  ;;  %v1108_v36 = vsel %vm795_vm1, %v995_v45, 0.0 }
 0x143   : > { %4903 = vst [vmem:[#allocation56_spill] sm:$0xff] %v3642_v30  ;;  %4904 = vst [vmem:[#allocation57_spill] sm:$0xff] %v3644_v46  ;;  %1162 = vadd.xlane.f32.xlu0 %v3382_v1  ;;  %1078 = vadd.xlane.f32.xlu1 %v3384_v14  ;;  %v3650_v32 = vpop.f32.mrb[33].mxu0  ;;  %v3652_v49 = vpop.f32.mrb[33].mxu1  ;;  %v3654_v50 = vadd.f32 %v1192_v10, %v1036_v19  ;;  %v3656_v60 = vadd.f32 %v1108_v36, %v994_v2 }
 0x144   : > { %4905 = vst [vmem:[#allocation58_spill] sm:$0xff] %v3650_v32  ;;  %4906 = vst [vmem:[#allocation59_spill] sm:$0xff] %v3652_v49  ;;  %v1038_v63 = vmul.f32 %v3644_v46, %v3644_v46  ;;  %v997_v25 = vmul.f32 %v3650_v32, %v3650_v32  ;;  %v1039_v45 = vmul.f32 %v3652_v49, %v3652_v49  ;;  %v944_v1 = vsel %vm795_vm1, %v3652_v49, 0.0 }
 0x145   : > { %v860_v14 = vsel %vm795_vm1, %v3650_v32, 0.0  ;;  %v3669_v19 = vadd.f32 %v944_v1, %v3644_v46  ;;  %v996_v36 = vmul.f32 %v3642_v30, %v3642_v30 }
 0x146   : > { %v3672_v10 = vadd.f32 %v860_v14, %v3642_v30  ;;  %v3676_v2 = vpop.f32.mrb[34].mxu0  ;;  %v3678_v44 = vpop.f32.mrb[34].mxu1  ;;  %v1196_v39 = vsel %vm795_vm1, %v1039_v45, 0.0  ;;  %v1112_v49 = vsel %vm795_vm1, %v997_v25, 0.0 }
 0x147   : > { %4907 = vst [vmem:[#allocation60_spill] sm:$0xff] %v3676_v2  ;;  %4908 = vst [vmem:[#allocation61_spill] sm:$0xff] %v3678_v44  ;;  %914 = vadd.xlane.f32.xlu1 %v3397_v43  ;;  %830 = vadd.xlane.f32.xlu0 %v3400_v47  ;;  %v3684_v1 = vpop.f32.mrb[35].mxu0  ;;  %v3686_v32 = vpop.f32.mrb[35].mxu1  ;;  %v3688_v14 = vadd.f32 %v1196_v39, %v1038_v63  ;;  %v3690_v46 = vadd.f32 %v1112_v49, %v996_v36 }
 0x148   : > { %4909 = vst [vmem:[#allocation62_spill] sm:$0xff] %v3684_v1  ;;  %4910 = vst [vmem:[#allocation63_spill] sm:$0xff] %v3686_v32  ;;  %v1040_v30 = vmul.f32 %v3678_v44, %v3678_v44  ;;  %v999_v45 = vmul.f32 %v3684_v1, %v3684_v1  ;;  %v1041_v25 = vmul.f32 %v3686_v32, %v3686_v32  ;;  %v948_v43 = vsel %vm795_vm1, %v3686_v32, 0.0 }
 0x149   : > { %v864_v47 = vsel %vm795_vm1, %v3684_v1, 0.0  ;;  %v3703_v39 = vadd.f32 %v948_v43, %v3678_v44  ;;  %v998_v49 = vmul.f32 %v3676_v2, %v3676_v2 }
 0x14a   : > { %v3706_v63 = vadd.f32 %v864_v47, %v3676_v2  ;;  %v3710_v36 = vpop.f32.mrb[36].mxu0  ;;  %v3712_v54 = vpop.f32.mrb[36].mxu1  ;;  %v1200_v40 = vsel %vm795_vm1, %v1041_v25, 0.0  ;;  %v1116_v32 = vsel %vm795_vm1, %v999_v45, 0.0 }
 0x14b   : > { %4911 = vst [vmem:[#allocation64_spill] sm:$0xff] %v3710_v36  ;;  %4912 = vst [vmem:[#allocation65_spill] sm:$0xff] %v3712_v54  ;;  %1166 = vadd.xlane.f32.xlu1 %v3416_v21  ;;  %1082 = vadd.xlane.f32.xlu0 %v3418_v55  ;;  %v3718_v43 = vpop.f32.mrb[37].mxu0  ;;  %v3720_v44 = vpop.f32.mrb[37].mxu1  ;;  %v3722_v47 = vadd.f32 %v1200_v40, %v1040_v30  ;;  %v3724_v1 = vadd.f32 %v1116_v32, %v998_v49 }
 0x14c   : > { %4913 = vst [vmem:[#allocation66_spill] sm:$0xff] %v3718_v43  ;;  %4914 = vst [vmem:[#allocation67_spill] sm:$0xff] %v3720_v44  ;;  %v1042_v2 = vmul.f32 %v3712_v54, %v3712_v54  ;;  %v1001_v25 = vmul.f32 %v3718_v43, %v3718_v43  ;;  %v1043_v45 = vmul.f32 %v3720_v44, %v3720_v44  ;;  %v952_v55 = vsel %vm795_vm1, %v3720_v44, 0.0 }
 0x14d   : > { %v868_v21 = vsel %vm795_vm1, %v3718_v43, 0.0  ;;  %v3737_v40 = vadd.f32 %v952_v55, %v3712_v54  ;;  %v1000_v32 = vmul.f32 %v3710_v36, %v3710_v36 }
 0x14e   : > { %v3740_v30 = vadd.f32 %v868_v21, %v3710_v36  ;;  %v3744_v49 = vpop.f32.mrb[38].mxu1  ;;  %v3746_v4 = vpop.f32.mrb[38].mxu0  ;;  %v1204_v28 = vsel %vm795_vm1, %v1043_v45, 0.0  ;;  %v1120_v44 = vsel %vm795_vm1, %v1001_v25, 0.0 }
 0x14f   : > { %4915 = vst [vmem:[#allocation68_spill] sm:$0xff] %v3744_v49  ;;  %4916 = vst [vmem:[#allocation69_spill] sm:$0xff] %v3746_v4  ;;  %918 = vadd.xlane.f32.xlu0 %v3431_v24  ;;  %834 = vadd.xlane.f32.xlu1 %v3434_v8  ;;  %v3752_v55 = vpop.f32.mrb[39].mxu0  ;;  %v3754_v43 = vpop.f32.mrb[39].mxu1  ;;  %v3756_v21 = vadd.f32 %v1204_v28, %v1042_v2  ;;  %v3758_v54 = vadd.f32 %v1120_v44, %v1000_v32 }
 0x150   : > { %4917 = vst [vmem:[#allocation70_spill] sm:$0xff] %v3752_v55  ;;  %4918 = vst [vmem:[#allocation71_spill] sm:$0xff] %v3754_v43  ;;  %v1044_v36 = vmul.f32 %v3744_v49, %v3744_v49  ;;  %v1003_v45 = vmul.f32 %v3752_v55, %v3752_v55  ;;  %v1045_v25 = vmul.f32 %v3754_v43, %v3754_v43  ;;  %v956_v24 = vsel %vm795_vm1, %v3754_v43, 0.0 }
 0x151   : > { %v872_v8 = vsel %vm795_vm1, %v3752_v55, 0.0  ;;  %v3771_v28 = vadd.f32 %v956_v24, %v3744_v49  ;;  %v1002_v2 = vmul.f32 %v3746_v4, %v3746_v4 }
 0x152   : > { %v3774_v44 = vadd.f32 %v872_v8, %v3746_v4  ;;  %v3778_v32 = vpop.f32.mrb[40].mxu1  ;;  %v3780_v5 = vpop.f32.mrb[40].mxu0  ;;  %v1208_v7 = vsel %vm795_vm1, %v1045_v25, 0.0  ;;  %v1124_v43 = vsel %vm795_vm1, %v1003_v45, 0.0 }
 0x153   : > { %4919 = vst [vmem:[#allocation72_spill] sm:$0xff] %v3778_v32  ;;  %4920 = vst [vmem:[#allocation73_spill] sm:$0xff] %v3780_v5  ;;  %1170 = vadd.xlane.f32.xlu0 %v3450_v31  ;;  %1086 = vadd.xlane.f32.xlu1 %v3452_v12  ;;  %v3786_v24 = vpop.f32.mrb[41].mxu0  ;;  %v3788_v49 = vpop.f32.mrb[41].mxu1  ;;  %v3790_v8 = vadd.f32 %v1208_v7, %v1044_v36  ;;  %v3792_v55 = vadd.f32 %v1124_v43, %v1002_v2 }
 0x154   : > { %4921 = vst [vmem:[#allocation74_spill] sm:$0xff] %v3786_v24  ;;  %4922 = vst [vmem:[#allocation75_spill] sm:$0xff] %v3788_v49  ;;  %v1046_v4 = vmul.f32 %v3778_v32, %v3778_v32  ;;  %v876_v25 = vsel %vm795_vm1, %v3786_v24, 0.0  ;;  %v1005_v45 = vmul.f32 %v3786_v24, %v3786_v24  ;;  %v960_v12 = vsel %vm795_vm1, %v3788_v49, 0.0 }
 0x155   : > { %v1047_v31 = vmul.f32 %v3788_v49, %v3788_v49  ;;  %v3805_v7 = vadd.f32 %v960_v12, %v3778_v32  ;;  %v3808_v36 = vadd.f32 %v876_v25, %v3780_v5  ;;  %v1004_v43 = vmul.f32 %v3780_v5, %v3780_v5 }
 0x156   : > { %v1128_v34 = vsel %vm795_vm1, %v1005_v45, 0.0 }
 0x157   : > { %v1212_v2 = vsel %vm795_vm1, %v1047_v31, 0.0  ;;  %922 = vadd.xlane.f32.xlu1 %v3465_v38  ;;  %838 = vadd.xlane.f32.xlu0 %v3468_v23  ;;  %v3818_v49 = vadd.f32 %v1128_v34, %v1004_v43 }
 0x158   : > { %v3816_v24 = vadd.f32 %v1212_v2, %v1046_v4 }
 0x15b   : > { %1174 = vadd.xlane.f32.xlu1 %v3484_v41  ;;  %1090 = vadd.xlane.f32.xlu0 %v3486_v35 }
 0x15f   : > { %926 = vadd.xlane.f32.xlu0 %v3499_v62  ;;  %842 = vadd.xlane.f32.xlu1 %v3502_v58 }
 0x163   : > { %1178 = vadd.xlane.f32.xlu0 %v3518_v52  ;;  %1094 = vadd.xlane.f32.xlu1 %v3520_v42 }
 0x167   : > { %930 = vadd.xlane.f32.xlu1 %v3533_v48  ;;  %846 = vadd.xlane.f32.xlu0 %v3536_v11 }
 0x16b   : > { %1182 = vadd.xlane.f32.xlu1 %v3552_v3  ;;  %1098 = vadd.xlane.f32.xlu0 %v3554_v29 }
 0x16f   : > { %934 = vadd.xlane.f32.xlu0 %v3567_v18  ;;  %850 = vadd.xlane.f32.xlu1 %v3570_v16 }
 0x173   : > { %1186 = vadd.xlane.f32.xlu0 %v3586_v13  ;;  %1102 = vadd.xlane.f32.xlu1 %v3588_v59 }
 0x177   : > { %938 = vadd.xlane.f32.xlu1 %v3601_v17  ;;  %854 = vadd.xlane.f32.xlu0 %v3604_v26 }
 0x17b   : > { %1190 = vadd.xlane.f32.xlu1 %v3620_v37  ;;  %1106 = vadd.xlane.f32.xlu0 %v3622_v15 }
 0x17f   : > { %942 = vadd.xlane.f32.xlu0 %v3635_v33  ;;  %858 = vadd.xlane.f32.xlu1 %v3638_v51 }
 0x183   : > { %1194 = vadd.xlane.f32.xlu0 %v3654_v50  ;;  %1110 = vadd.xlane.f32.xlu1 %v3656_v60 }
 0x187   : > { %946 = vadd.xlane.f32.xlu1 %v3669_v19  ;;  %862 = vadd.xlane.f32.xlu0 %v3672_v10 }
 0x18b   : > { %1198 = vadd.xlane.f32.xlu1 %v3688_v14  ;;  %1114 = vadd.xlane.f32.xlu0 %v3690_v46 }
 0x18f   : > { %950 = vadd.xlane.f32.xlu0 %v3703_v39  ;;  %866 = vadd.xlane.f32.xlu1 %v3706_v63 }
 0x193   : > { %1202 = vadd.xlane.f32.xlu0 %v3722_v47  ;;  %1118 = vadd.xlane.f32.xlu1 %v3724_v1 }
 0x194   : > { %v883_v15 = vpop.xlane.xlu1 %882  ;;  %v799_v29 = vpop.xlane.xlu0 %798 }
 0x195   : > { %v3850_v42 = vmul.f32 0.0051020407, %v883_v15  ;;  %v3862_v62 = vmul.f32 0.0051020407, %v799_v29 }
 0x197   : > { %954 = vadd.xlane.f32.xlu1 %v3737_v40  ;;  %870 = vadd.xlane.f32.xlu0 %v3740_v30  ;;  %v1321_v46 = vmul.f32 %v3850_v42, %v3850_v42  ;;  %v1300_v18 = vmul.f32 %v3862_v62, %v3862_v62 }
 0x198   : > { %v1135_v59 = vpop.xlane.xlu1 %1134  ;;  %v1051_v34 = vpop.xlane.xlu0 %1050 }
 0x199   : > { %v1279_v35 = vmul.f32 0.0051020407, %v1135_v59  ;;  %v1258_v60 = vmul.f32 0.0051020407, %v1051_v34 }
 0x19b   : > { %1206 = vadd.xlane.f32.xlu1 %v3756_v21  ;;  %1122 = vadd.xlane.f32.xlu0 %v3758_v54  ;;  %v1363_v4 = vsub.f32 %v1279_v35, %v1321_v46  ;;  %v1342_v33 = vsub.f32 %v1258_v60, %v1300_v18 }
 0x19c   : > { %v1055_v38 = vpop.xlane.xlu1 %1054  ;;  %v803_v23 = vpop.xlane.xlu0 %802 }
 0x19d   : > { %v3858_v41 = vmul.f32 0.0051020407, %v803_v23  ;;  %v1405_v48 = vmax.f32 %v1363_v4, 0.0  ;;  %v1259_v3 = vmul.f32 0.0051020407, %v1055_v38  ;;  %v1384_v14 = vmax.f32 %v1342_v33, 0.0 }
 0x19f   : > { %958 = vadd.xlane.f32.xlu0 %v3771_v28  ;;  %874 = vadd.xlane.f32.xlu1 %v3774_v44  ;;  %v1301_v11 = vmul.f32 %v3858_v41, %v3858_v41  ;;  %v1447_v17 = vadd.f32 1e-05, %v1405_v48  ;;  %v1426_v21 = vadd.f32 1e-05, %v1384_v14 }
 0x1a0   : > { %v887_v58 = vpop.xlane.xlu0 %886  ;;  %v807_v52 = vpop.xlane.xlu1 %806 }
 0x1a1   : > { %v3866_v54 = vmul.f32 0.0051020407, %v887_v58  ;;  %v1343_v26 = vsub.f32 %v1259_v3, %v1301_v11  ;;  %2700 = vrsqrt.f32 %v1447_v17  ;;  %v3876_v39 = vmul.f32 0.0051020407, %v807_v52 }
 0x1a3   : > { %1210 = vadd.xlane.f32.xlu0 %v3790_v8  ;;  %1126 = vadd.xlane.f32.xlu1 %v3792_v55  ;;  %v1322_v51 = vmul.f32 %v3866_v54, %v3866_v54  ;;  %v1385_v10 = vmax.f32 %v1343_v26, 0.0  ;;  %v1302_v28 = vmul.f32 %v3876_v39, %v3876_v39 }
 0x1a4   : > { %v1139_v16 = vpop.xlane.xlu0 %1138  ;;  %v891_v13 = vpop.xlane.xlu1 %890 }
 0x1a5   : > { %v1280_v37 = vmul.f32 0.0051020407, %v1139_v16  ;;  %v1427_v30 = vadd.f32 1e-05, %v1385_v10  ;;  %v3882_v44 = vmul.f32 0.0051020407, %v891_v13 }
 0x1a6   : > { %v1511_v16 = vld [vmem:[%s3889_s13 + $0x8] sm:$0xff] }
 0x1a7   : > { %962 = vadd.xlane.f32.xlu1 %v3805_v7  ;;  %878 = vadd.xlane.f32.xlu0 %v3808_v36  ;;  %v1364_v1 = vsub.f32 %v1280_v37, %v1322_v51  ;;  %2702 = vrsqrt.f32 %v1427_v30  ;;  %v1323_v31 = vmul.f32 %v3882_v44, %v3882_v44  ;;  %v1531_v36 = vld [vmem:[%s3889_s13 + $0xa8] sm:$0xff]  ;;  %v1510_v51 = vld [vmem:[%s3889_s13] sm:$0xff]  ;;  %v1532_v30 = vld [vmem:[%s3889_s13 + $0xb0] sm:$0xff] }
 0x1a8   : > { %v1059_v50 = vpop.xlane.xlu0 %1058  ;;  %v1143_v19 = vpop.xlane.xlu1 %1142  ;;  %2704 = vrsqrt.f32 %v1426_v21 }
 0x1a9   : > { %v1260_v63 = vmul.f32 0.0051020407, %v1059_v50  ;;  %v1406_v55 = vmax.f32 %v1364_v1, 0.0  ;;  %v1281_v45 = vmul.f32 0.0051020407, %v1143_v19 }
 0x1ab   : > { %1214 = vadd.xlane.f32.xlu1 %v3816_v24  ;;  %1130 = vadd.xlane.f32.xlu0 %v3818_v49  ;;  %v1344_v24 = vsub.f32 %v1260_v63, %v1302_v28  ;;  %v1448_v25 = vadd.f32 1e-05, %v1406_v55  ;;  %v2701_v12 = vpop.eup %2700  ;;  %v1365_v59 = vsub.f32 %v1281_v45, %v1323_v31 }
 0x1ac   : > { %v895_v47 = vpop.xlane.xlu0 %894  ;;  %v811_v40 = vpop.xlane.xlu1 %810  ;;  %v1573_v46 = vmul.f32 %v2701_v12, %v1531_v36 }
 0x1ad   : > { %v3893_v7 = vmul.f32 0.0051020407, %v895_v47  ;;  %v1386_v43 = vmax.f32 %v1344_v24, 0.0  ;;  %v3896_v2 = vmul.f32 0.0051020407, %v811_v40  ;;  %2706 = vrsqrt.f32 %v1448_v25 }
 0x1ae   : > { %v1407_v48 = vmax.f32 %v1365_v59, 0.0  ;;  %v1615_v3 = vmul.f32 %v1573_v46, %v3850_v42 }
 0x1af   : > { %v1324_v38 = vmul.f32 %v3893_v7, %v3893_v7  ;;  %v1428_v23 = vadd.f32 1e-05, %v1386_v43  ;;  %v1303_v4 = vmul.f32 %v3896_v2, %v3896_v2 }
 0x1b0   : > { %v1147_v49 = vpop.xlane.xlu0 %1146  ;;  %v1063_v8 = vpop.xlane.xlu1 %1062  ;;  %v1449_v50 = vadd.f32 1e-05, %v1407_v48 }
 0x1b1   : > { %v1282_v34 = vmul.f32 0.0051020407, %v1147_v49  ;;  %v1261_v35 = vmul.f32 0.0051020407, %v1063_v8  ;;  %v2703_v18 = vpop.eup %2702  ;;  %2708 = vrsqrt.f32 %v1428_v23  ;;  %v1512_v23 = vld [vmem:[%s3889_s13 + $0x10] sm:$0xff] }
 0x1b2   : > { %v2705_v17 = vpop.eup %2704  ;;  %v1553_v1 = vmul.f32 %v2703_v18, %v1511_v16  ;;  %2710 = vrsqrt.f32 %v1449_v50 }
 0x1b3   : > { %v1366_v11 = vsub.f32 %v1282_v34, %v1324_v38  ;;  %v1345_v60 = vsub.f32 %v1261_v35, %v1303_v4  ;;  %v1552_v40 = vmul.f32 %v2705_v17, %v1510_v51 }
 0x1b4   : > { %v899_v15 = vpop.xlane.xlu1 %898  ;;  %v815_v29 = vpop.xlane.xlu0 %814  ;;  %v1595_v34 = vmul.f32 %v1553_v1, %v3858_v41 }
 0x1b5   : > { %v3904_v13 = vmul.f32 0.0051020407, %v899_v15  ;;  %v3906_v26 = vmul.f32 0.0051020407, %v815_v29  ;;  %v1408_v19 = vmax.f32 %v1366_v11, 0.0  ;;  %v1387_v42 = vmax.f32 %v1345_v60, 0.0 }
 0x1b7   : > { %v2707_v63 = vpop.eup %2706  ;;  %v1325_v47 = vmul.f32 %v3904_v13, %v3904_v13  ;;  %v1304_v55 = vmul.f32 %v3906_v26, %v3906_v26  ;;  %v1450_v24 = vadd.f32 1e-05, %v1408_v19  ;;  %v1429_v8 = vadd.f32 1e-05, %v1387_v42 }
 0x1b8   : > { %v1151_v58 = vpop.xlane.xlu1 %1150  ;;  %v1067_v52 = vpop.xlane.xlu0 %1066  ;;  %v1574_v45 = vmul.f32 %v2707_v63, %v1532_v30 }
 0x1b9   : > { %v1283_v10 = vmul.f32 0.0051020407, %v1151_v58  ;;  %v1262_v14 = vmul.f32 0.0051020407, %v1067_v52  ;;  %2712 = vrsqrt.f32 %v1450_v24  ;;  %v1594_v58 = vmul.f32 %v1552_v40, %v3862_v62  ;;  %v1533_v62 = vld [vmem:[%s3889_s13 + $0xb8] sm:$0xff]  ;;  %v3943_v24 = vld [vmem:[%s3889_s13 + $0xc0] sm:$0xff] }
 0x1ba   : > { %2714 = vrsqrt.f32 %v1429_v8 }
 0x1bb   : > { %v1367_v49 = vsub.f32 %v1283_v10, %v1325_v47  ;;  %v1346_v25 = vsub.f32 %v1262_v14, %v1304_v55  ;;  %v2709_v59 = vpop.eup %2708 }
 0x1bc   : > { %v903_v37 = vpop.xlane.xlu0 %902  ;;  %v819_v33 = vpop.xlane.xlu1 %818  ;;  %1720 = vrot.lane.b32.xlu1 %v1615_v3, %s2801_s14  ;;  %v1554_v41 = vmul.f32 %v2709_v59, %v1512_v23 }
 0x1bd   : > { %v3915_v12 = vmul.f32 0.0051020407, %v903_v37  ;;  %v3917_v31 = vmul.f32 0.0051020407, %v819_v33  ;;  %v1409_v15 = vmax.f32 %v1367_v49, 0.0  ;;  %v1388_v35 = vmax.f32 %v1346_v25, 0.0  ;;  %v2711_v16 = vpop.eup %2710 }
 0x1be   : > { %v1616_v37 = vmul.f32 %v1574_v45, %v3866_v54  ;;  %v1575_v63 = vmul.f32 %v2711_v16, %v1533_v62 }
 0x1bf   : > { %v1326_v4 = vmul.f32 %v3915_v12, %v3915_v12  ;;  %v1305_v52 = vmul.f32 %v3917_v31, %v3917_v31  ;;  %v1430_v3 = vadd.f32 1e-05, %v1388_v35 }
 0x1c0   : > { %v1155_v21 = vpop.xlane.xlu0 %1154  ;;  %v1071_v28 = vpop.xlane.xlu1 %1070  ;;  %1853 = vperm.xlu1 %2697, %v1553_v1   ;;  %v1596_v1 = vmul.f32 %v1554_v41, %v3876_v39 }
 0x1c1   : > { %1848 = vperm.xlu0 %2696, %v1552_v40   ;;  %v1284_v29 = vmul.f32 0.0051020407, %v1155_v21  ;;  %v1263_v38 = vmul.f32 0.0051020407, %v1071_v28  ;;  %v1513_v28 = vld [vmem:[%s3889_s13 + $0x18] sm:$0xff] }
 0x1c3   : > { %v1368_v60 = vsub.f32 %v1284_v29, %v1326_v4  ;;  %v1347_v18 = vsub.f32 %v1263_v38, %v1305_v52  ;;  %v2713_v54 = vpop.eup %2712 }
 0x1c4   : > { %v907_v36 = vpop.xlane.xlu1 %906  ;;  %v823_v43 = vpop.xlane.xlu0 %822  ;;  %1958 = vperm.xlu1 %2697, %v1574_v45   ;;  %v1617_v45 = vmul.f32 %v1575_v63, %v3882_v44 }
 0x1c5   : > { %1953 = vperm.xlu0 %2696, %v1573_v46   ;;  %v1451_v46 = vadd.f32 1e-05, %v1409_v15  ;;  %v3928_v17 = vmul.f32 0.0051020407, %v907_v36  ;;  %v3932_v33 = vmul.f32 0.0051020407, %v823_v43  ;;  %v2715_v40 = vpop.eup %2714  ;;  %v1576_v15 = vmul.f32 %v2713_v54, %v3943_v24 }
 0x1c6   : > { %v1410_v19 = vmax.f32 %v1368_v60, 0.0  ;;  %v1389_v42 = vmax.f32 %v1347_v18, 0.0  ;;  %v1555_v43 = vmul.f32 %v2715_v40, %v1513_v28 }
 0x1c7   : > { %2716 = vrsqrt.f32 %v1451_v46  ;;  %v1327_v47 = vmul.f32 %v3928_v17, %v3928_v17  ;;  %v1306_v30 = vmul.f32 %v3932_v33, %v3932_v33  ;;  %v1618_v52 = vmul.f32 %v1576_v15, %v3893_v7 }
 0x1c8   : > { %v1159_v48 = vpop.xlane.xlu1 %1158  ;;  %v1075_v11 = vpop.xlane.xlu0 %1074  ;;  %1680 = vrot.lane.b32.xlu1 %v1595_v34, %s2801_s14  ;;  %2718 = vrsqrt.f32 %v1430_v3  ;;  %v1452_v39 = vadd.f32 1e-05, %v1410_v19  ;;  %v1431_v8 = vadd.f32 1e-05, %v1389_v42  ;;  %v3961_v3 = vld [vmem:[%s3889_s13 + $0x20] sm:$0xff] }
 0x1c9   : > { %1678 = vrot.lane.b32.xlu0 %v1594_v58, %s2801_s14  ;;  %v1285_v10 = vmul.f32 0.0051020407, %v1159_v48  ;;  %v1264_v14 = vmul.f32 0.0051020407, %v1075_v11 }
 0x1ca   : > { %2720 = vrsqrt.f32 %v1452_v39 }
 0x1cb   : > { %v1369_v49 = vsub.f32 %v1285_v10, %v1327_v47  ;;  %v1348_v25 = vsub.f32 %v1264_v14, %v1306_v30  ;;  %2722 = vrsqrt.f32 %v1431_v8  ;;  %v3981_v8 = vld [vmem:[%s3889_s13 + $0xd0] sm:$0xff] }
 0x1cc   : > { %v911_v51 = vpop.xlane.xlu0 %910  ;;  %v827_v50 = vpop.xlane.xlu1 %826  ;;  %1858 = vperm.xlu1 %2697, %v1554_v41   ;;  %v3958_v41 = vld [vmem:[%s3889_s13 + $0xc8] sm:$0xff] }
 0x1cd   : > { %1722 = vrot.lane.b32.xlu0 %v1616_v37, %s2801_s14  ;;  %v3946_v36 = vmul.f32 0.0051020407, %v911_v51  ;;  %v3949_v29 = vmul.f32 0.0051020407, %v827_v50  ;;  %v1411_v35 = vmax.f32 %v1369_v49, 0.0  ;;  %v1390_v23 = vmax.f32 %v1348_v25, 0.0 }
 0x1ce   : > { %v1597_v51 = vmul.f32 %v1555_v43, %v3896_v2  ;;  %v3978_v49 = vld [vmem:[%s3889_s13 + $0x28] sm:$0xff] }
 0x1cf   : > { %v1328_v58 = vmul.f32 %v3946_v36, %v3946_v36  ;;  %v1307_v11 = vmul.f32 %v3949_v29, %v3949_v29  ;;  %v1453_v18 = vadd.f32 1e-05, %v1411_v35  ;;  %v1432_v37 = vadd.f32 1e-05, %v1390_v23 }
 0x1d0   : > { %v1163_v55 = vpop.xlane.xlu0 %1162  ;;  %v1079_v21 = vpop.xlane.xlu1 %1078  ;;  %1682 = vrot.lane.b32.xlu1 %v1596_v1, %s2801_s14 }
 0x1d1   : > { %1963 = vperm.xlu0 %2696, %v1575_v63   ;;  %v1286_v38 = vmul.f32 0.0051020407, %v1163_v55  ;;  %v1265_v44 = vmul.f32 0.0051020407, %v1079_v21  ;;  %v2717_v4 = vpop.eup %2716  ;;  %2724 = vrsqrt.f32 %v1453_v18 }
 0x1d2   : > { %v2719_v48 = vpop.eup %2718  ;;  %v1577_v50 = vmul.f32 %v2717_v4, %v3958_v41  ;;  %2726 = vrsqrt.f32 %v1432_v37 }
 0x1d3   : > { %v1370_v16 = vsub.f32 %v1286_v38, %v1328_v58  ;;  %v1349_v62 = vsub.f32 %v1265_v44, %v1307_v11  ;;  %v1556_v19 = vmul.f32 %v2719_v48, %v3961_v3 }
 0x1d4   : > { %v915_v59 = vpop.xlane.xlu1 %914  ;;  %v831_v34 = vpop.xlane.xlu0 %830  ;;  %1724 = vrot.lane.b32.xlu1 %v1617_v45, %s2801_s14 }
 0x1d5   : > { %1863 = vperm.xlu0 %2696, %v1555_v43   ;;  %v3965_v7 = vmul.f32 0.0051020407, %v915_v59  ;;  %v3969_v10 = vmul.f32 0.0051020407, %v831_v34  ;;  %v1412_v14 = vmax.f32 %v1370_v16, 0.0  ;;  %v1391_v2 = vmax.f32 %v1349_v62, 0.0  ;;  %v2721_v47 = vpop.eup %2720 }
 0x1d6   : > { %v1598_v30 = vmul.f32 %v1556_v19, %v3906_v26  ;;  %v2723_v55 = vpop.eup %2722  ;;  %v1619_v59 = vmul.f32 %v1577_v50, %v3904_v13  ;;  %v1578_v35 = vmul.f32 %v2721_v47, %v3981_v8  ;;  %v3998_v62 = vld [vmem:[%s3889_s13 + $0xd8] sm:$0xff] }
 0x1d7   : > { %v1329_v40 = vmul.f32 %v3965_v7, %v3965_v7  ;;  %v1308_v21 = vmul.f32 %v3969_v10, %v3969_v10  ;;  %v1454_v25 = vadd.f32 1e-05, %v1412_v14  ;;  %v1433_v43 = vadd.f32 1e-05, %v1391_v2 }
 0x1d8   : > { %v1167_v46 = vpop.xlane.xlu1 %1166  ;;  %v1083_v60 = vpop.xlane.xlu0 %1082  ;;  %1968 = vperm.xlu1 %2697, %v1576_v15   ;;  %v1557_v34 = vmul.f32 %v2723_v55, %v3978_v49 }
 0x1d9   : > { %1726 = vrot.lane.b32.xlu0 %v1618_v52, %s2801_s14  ;;  %v1287_v63 = vmul.f32 0.0051020407, %v1167_v46  ;;  %v1266_v54 = vmul.f32 0.0051020407, %v1083_v60  ;;  %2728 = vrsqrt.f32 %v1454_v25  ;;  %v1620_v46 = vmul.f32 %v1578_v35, %v3915_v12 }
 0x1da   : > { %2730 = vrsqrt.f32 %v1433_v43  ;;  %v1599_v14 = vmul.f32 %v1557_v34, %v3917_v31 }
 0x1db   : > { %v1371_v45 = vsub.f32 %v1287_v63, %v1329_v40  ;;  %v1350_v15 = vsub.f32 %v1266_v54, %v1308_v21  ;;  %v2725_v48 = vpop.eup %2724 }
 0x1dc   : > { %v919_v1 = vpop.xlane.xlu0 %918  ;;  %v835_v42 = vpop.xlane.xlu1 %834  ;;  %1684 = vrot.lane.b32.xlu1 %v1597_v51, %s2801_s14  ;;  %v4001_v51 = vld [vmem:[%s3889_s13 + $0x30] sm:$0xff]  ;;  %v1579_v63 = vmul.f32 %v2725_v48, %v3998_v62 }
 0x1dd   : > { %1973 = vperm.xlu0 %2696, %v1577_v50   ;;  %v3985_v26 = vmul.f32 0.0051020407, %v919_v1  ;;  %v3989_v38 = vmul.f32 0.0051020407, %v835_v42  ;;  %v1413_v4 = vmax.f32 %v1371_v45, 0.0  ;;  %v1392_v13 = vmax.f32 %v1350_v15, 0.0  ;;  %v2727_v60 = vpop.eup %2726 }
 0x1de   : > { %v1558_v2 = vmul.f32 %v2727_v60, %v4001_v51 }
 0x1df   : > { %v1330_v11 = vmul.f32 %v3985_v26, %v3985_v26  ;;  %v1309_v18 = vmul.f32 %v3989_v38, %v3989_v38  ;;  %v1455_v50 = vadd.f32 1e-05, %v1413_v4  ;;  %v1434_v1 = vadd.f32 1e-05, %v1392_v13 }
 0x1e0   : > { %v1171_v28 = vpop.xlane.xlu0 %1170  ;;  %v1087_v39 = vpop.xlane.xlu1 %1086  ;;  %1868 = vperm.xlu1 %2697, %v1556_v19   ;;  %v1600_v25 = vmul.f32 %v1558_v2, %v3932_v33  ;;  %v1621_v13 = vmul.f32 %v1579_v63, %v3928_v17 }
 0x1e1   : > { %1686 = vrot.lane.b32.xlu0 %v1598_v30, %s2801_s14  ;;  %v1288_v58 = vmul.f32 0.0051020407, %v1171_v28  ;;  %v1267_v52 = vmul.f32 0.0051020407, %v1087_v39  ;;  %2732 = vrsqrt.f32 %v1455_v50 }
 0x1e2   : > { %2734 = vrsqrt.f32 %v1434_v1 }
 0x1e3   : > { %v1372_v19 = vsub.f32 %v1288_v58, %v1330_v11  ;;  %v1351_v42 = vsub.f32 %v1267_v52, %v1309_v18  ;;  %v2729_v28 = vpop.eup %2728 }
 0x1e4   : > { %v923_v23 = vpop.xlane.xlu1 %922  ;;  %v839_v44 = vpop.xlane.xlu0 %838  ;;  %1728 = vrot.lane.b32.xlu1 %v1619_v59, %s2801_s14 }
 0x1e5   : > { %1873 = vperm.xlu0 %2696, %v1557_v34   ;;  %v4005_v12 = vmul.f32 0.0051020407, %v923_v23  ;;  %v4009_v54 = vmul.f32 0.0051020407, %v839_v44  ;;  %v1414_v30 = vmax.f32 %v1372_v19, 0.0  ;;  %v1393_v31 = vmax.f32 %v1351_v42, 0.0  ;;  %v2731_v45 = vpop.eup %2730 }
 0x1e6   : > { %v4018_v34 = vld [vmem:[%s3889_s13 + $0x38] sm:$0xff] }
 0x1e7   : > { %v1331_v39 = vmul.f32 %v4005_v12, %v4005_v12  ;;  %v1310_v43 = vmul.f32 %v4009_v54, %v4009_v54  ;;  %v1456_v23 = vadd.f32 1e-05, %v1414_v30  ;;  %v1435_v4 = vadd.f32 1e-05, %v1393_v31 }
 0x1e8   : > { %v1175_v16 = vpop.xlane.xlu1 %1174  ;;  %v1091_v37 = vpop.xlane.xlu0 %1090  ;;  %1978 = vperm.xlu1 %2697, %v1578_v35   ;;  %v4021_v35 = vld [vmem:[%s3889_s13 + $0xe0] sm:$0xff]  ;;  %v1559_v52 = vmul.f32 %v2731_v45, %v4018_v34 }
 0x1e9   : > { %1730 = vrot.lane.b32.xlu0 %v1620_v46, %s2801_s14  ;;  %v1289_v55 = vmul.f32 0.0051020407, %v1175_v16  ;;  %v1268_v21 = vmul.f32 0.0051020407, %v1091_v37  ;;  %v1580_v48 = vmul.f32 %v2729_v28, %v4021_v35  ;;  %2736 = vrsqrt.f32 %v1456_v23 }
 0x1ea   : > { %2738 = vrsqrt.f32 %v1435_v4  ;;  %v1601_v28 = vmul.f32 %v1559_v52, %v3949_v29 }
 0x1eb   : > { %v1373_v44 = vsub.f32 %v1289_v55, %v1331_v39  ;;  %v1352_v58 = vsub.f32 %v1268_v21, %v1310_v43  ;;  %v2733_v50 = vpop.eup %2732  ;;  %v1622_v1 = vmul.f32 %v1580_v48, %v3946_v36 }
 0x1ec   : > { %v927_v47 = vpop.xlane.xlu0 %926  ;;  %v843_v40 = vpop.xlane.xlu1 %842  ;;  %1688 = vrot.lane.b32.xlu1 %v1599_v14, %s2801_s14 }
 0x1ed   : > { %1983 = vperm.xlu0 %2696, %v1579_v63   ;;  %v4025_v33 = vmul.f32 0.0051020407, %v927_v47  ;;  %v4029_v11 = vmul.f32 0.0051020407, %v843_v40  ;;  %v1415_v18 = vmax.f32 %v1373_v44, 0.0  ;;  %v1394_v17 = vmax.f32 %v1352_v58, 0.0  ;;  %v2735_v42 = vpop.eup %2734 }
 0x1ee   : > { %v4038_v47 = vld [vmem:[%s3889_s13 + $0xe8] sm:$0xff]  ;;  %v4041_v40 = vld [vmem:[%s3889_s13 + $0x40] sm:$0xff] }
 0x1ef   : > { %v1332_v19 = vmul.f32 %v4025_v33, %v4025_v33  ;;  %v1311_v14 = vmul.f32 %v4029_v11, %v4029_v11  ;;  %v1457_v30 = vadd.f32 1e-05, %v1415_v18  ;;  %v1436_v31 = vadd.f32 1e-05, %v1394_v17  ;;  %v4058_v18 = vld [vmem:[%s3889_s13 + $0x48] sm:$0xff] }
 0x1f0   : > { %v1179_v15 = vpop.xlane.xlu0 %1178  ;;  %v1095_v59 = vpop.xlane.xlu1 %1094  ;;  %1878 = vperm.xlu1 %2697, %v1558_v2   ;;  %v1581_v39 = vmul.f32 %v2733_v50, %v4038_v47 }
 0x1f1   : > { %1690 = vrot.lane.b32.xlu0 %v1600_v25, %s2801_s14  ;;  %v1290_v16 = vmul.f32 0.0051020407, %v1179_v15  ;;  %v1269_v37 = vmul.f32 0.0051020407, %v1095_v59  ;;  %v1560_v25 = vmul.f32 %v2735_v42, %v4041_v40  ;;  %2740 = vrsqrt.f32 %v1457_v30 }
 0x1f2   : > { %2742 = vrsqrt.f32 %v1436_v31 }
 0x1f3   : > { %v1374_v55 = vsub.f32 %v1290_v16, %v1332_v19  ;;  %v1353_v21 = vsub.f32 %v1269_v37, %v1311_v14  ;;  %v2737_v4 = vpop.eup %2736  ;;  %v4061_v16 = vld [vmem:[%s3889_s13 + $0xf0] sm:$0xff] }
 0x1f4   : > { %v931_v46 = vpop.xlane.xlu1 %930  ;;  %v847_v60 = vpop.xlane.xlu0 %846  ;;  %1732 = vrot.lane.b32.xlu1 %v1621_v13, %s2801_s14  ;;  %v1602_v13 = vmul.f32 %v1560_v25, %v3969_v10  ;;  %v1582_v14 = vmul.f32 %v2737_v4, %v4061_v16 }
 0x1f5   : > { %1883 = vperm.xlu0 %2696, %v1559_v52   ;;  %v4045_v36 = vmul.f32 0.0051020407, %v931_v46  ;;  %v4049_v45 = vmul.f32 0.0051020407, %v847_v60  ;;  %v1416_v59 = vmax.f32 %v1374_v55, 0.0  ;;  %v1395_v29 = vmax.f32 %v1353_v21, 0.0  ;;  %v2739_v52 = vpop.eup %2738 }
 0x1f6   : > { %v1561_v42 = vmul.f32 %v2739_v52, %v4058_v18 }
 0x1f7   : > { %v1333_v58 = vmul.f32 %v4045_v36, %v4045_v36  ;;  %v1458_v17 = vadd.f32 1e-05, %v1416_v59  ;;  %v1437_v50 = vadd.f32 1e-05, %v1395_v29  ;;  %v4078_v29 = vld [vmem:[%s3889_s13 + $0xf8] sm:$0xff] }
 0x1f8   : > { %v1183_v63 = vpop.xlane.xlu1 %1182  ;;  %v1099_v2 = vpop.xlane.xlu0 %1098  ;;  %1988 = vperm.xlu1 %2697, %v1580_v48   ;;  %v1312_v48 = vmul.f32 %v4049_v45, %v4049_v45 }
 0x1f9   : > { %1734 = vrot.lane.b32.xlu0 %v1622_v1, %s2801_s14  ;;  %v1291_v23 = vmul.f32 0.0051020407, %v1183_v63  ;;  %v1270_v44 = vmul.f32 0.0051020407, %v1099_v2  ;;  %v1623_v1 = vmul.f32 %v1581_v39, %v3965_v7  ;;  %2744 = vrsqrt.f32 %v1458_v17 }
 0x1fa   : > { %2746 = vrsqrt.f32 %v1437_v50 }
 0x1fb   : > { %v1375_v37 = vsub.f32 %v1291_v23, %v1333_v58  ;;  %v1354_v19 = vsub.f32 %v1270_v44, %v1312_v48  ;;  %v4081_v44 = vld [vmem:[%s3889_s13 + $0x50] sm:$0xff]  ;;  %v1603_v48 = vmul.f32 %v1561_v42, %v3989_v38 }
 0x1fc   : > { %v935_v43 = vpop.xlane.xlu0 %934  ;;  %v851_v15 = vpop.xlane.xlu1 %850  ;;  %1692 = vrot.lane.b32.xlu1 %v1601_v28, %s2801_s14 }
 0x1fd   : > { %1993 = vperm.xlu0 %2696, %v1581_v39   ;;  %v4065_v10 = vmul.f32 0.0051020407, %v935_v43  ;;  %v4069_v63 = vmul.f32 0.0051020407, %v851_v15  ;;  %v1417_v55 = vmax.f32 %v1375_v37, 0.0  ;;  %v1396_v7 = vmax.f32 %v1354_v19, 0.0  ;;  %v2741_v28 = vpop.eup %2740 }
 0x1fe   : > { %v2743_v43 = vpop.eup %2742 }
 0x1ff   : > { %v1334_v39 = vmul.f32 %v4065_v10, %v4065_v10  ;;  %v1313_v15 = vmul.f32 %v4069_v63, %v4069_v63  ;;  %v1459_v4 = vadd.f32 1e-05, %v1417_v55 }
 0x200   : > { %v1187_v46 = vpop.xlane.xlu0 %1186  ;;  %v1103_v60 = vpop.xlane.xlu1 %1102  ;;  %1888 = vperm.xlu1 %2697, %v1560_v25   ;;  %v1624_v25 = vmul.f32 %v1582_v14, %v3985_v26 }
 0x201   : > { %1694 = vrot.lane.b32.xlu0 %v1602_v13, %s2801_s14  ;;  %v1292_v31 = vmul.f32 0.0051020407, %v1187_v46  ;;  %v1271_v21 = vmul.f32 0.0051020407, %v1103_v60  ;;  %v1438_v13 = vadd.f32 1e-05, %v1396_v7  ;;  %v1583_v46 = vmul.f32 %v2741_v28, %v4078_v29 }
 0x202   : > { %v1562_v60 = vmul.f32 %v2743_v43, %v4081_v44  ;;  %2748 = vrsqrt.f32 %v1459_v4  ;;  %v4098_v28 = vld [vmem:[%s3889_s13 + $0x58] sm:$0xff] }
 0x203   : > { %v1376_v58 = vsub.f32 %v1292_v31, %v1334_v39  ;;  %v1355_v52 = vsub.f32 %v1271_v21, %v1313_v15  ;;  %2750 = vrsqrt.f32 %v1438_v13  ;;  %v4101_v39 = vld [vmem:[%s3889_s13 + $0x100] sm:$0xff] }
 0x204   : > { %v939_v2 = vpop.xlane.xlu1 %938  ;;  %v855_v30 = vpop.xlane.xlu0 %854  ;;  %1736 = vrot.lane.b32.xlu1 %v1623_v1, %s2801_s14 }
 0x205   : > { %1893 = vperm.xlu0 %2696, %v1561_v42   ;;  %v4085_v26 = vmul.f32 0.0051020407, %v939_v2  ;;  %v4089_v17 = vmul.f32 0.0051020407, %v855_v30  ;;  %v1418_v19 = vmax.f32 %v1376_v58, 0.0  ;;  %v1397_v38 = vmax.f32 %v1355_v52, 0.0 }
 0x206   : > { %v1604_v30 = vmul.f32 %v1562_v60, %v4009_v54 }
 0x207   : > { %v1335_v2 = vmul.f32 %v4085_v26, %v4085_v26  ;;  %v1314_v31 = vmul.f32 %v4089_v17, %v4089_v17  ;;  %v1439_v15 = vadd.f32 1e-05, %v1397_v38 }
 0x208   : > { %v1191_v59 = vpop.xlane.xlu1 %1190  ;;  %v1107_v23 = vpop.xlane.xlu0 %1106  ;;  %1998 = vperm.xlu1 %2697, %v1582_v14  }
 0x209   : > { %1738 = vrot.lane.b32.xlu0 %v1624_v25, %s2801_s14  ;;  %v1293_v1 = vmul.f32 0.0051020407, %v1191_v59  ;;  %v1272_v42 = vmul.f32 0.0051020407, %v1107_v23  ;;  %v2745_v14 = vpop.eup %2744  ;;  %v1460_v25 = vadd.f32 1e-05, %v1418_v19  ;;  %v1625_v23 = vmul.f32 %v1583_v46, %v4005_v12 }
 0x20a   : > { %v2747_v55 = vpop.eup %2746  ;;  %v1584_v58 = vmul.f32 %v2745_v14, %v4101_v39 }
 0x20b   : > { %v1377_v43 = vsub.f32 %v1293_v1, %v1335_v2  ;;  %v1356_v59 = vsub.f32 %v1272_v42, %v1314_v31  ;;  %v1563_v4 = vmul.f32 %v2747_v55, %v4098_v28  ;;  %2752 = vrsqrt.f32 %v1460_v25  ;;  %v4121_v55 = vld [vmem:[%s3889_s13 + $0x60] sm:$0xff] }
 0x20c   : > { %v943_v37 = vpop.xlane.xlu0 %942  ;;  %v859_v50 = vpop.xlane.xlu1 %858  ;;  %1696 = vrot.lane.b32.xlu1 %v1603_v48, %s2801_s14  ;;  %2754 = vrsqrt.f32 %v1439_v15 }
 0x20d   : > { %2003 = vperm.xlu0 %2696, %v1583_v46   ;;  %v4105_v54 = vmul.f32 0.0051020407, %v943_v37  ;;  %v4109_v13 = vmul.f32 0.0051020407, %v859_v50  ;;  %v1398_v12 = vmax.f32 %v1356_v59, 0.0  ;;  %v2749_v37 = vpop.eup %2748  ;;  %v1626_v50 = vmul.f32 %v1584_v58, %v4025_v33 }
 0x20e   : > { %v2751_v38 = vpop.eup %2750 }
 0x20f   : > { %v1336_v1 = vmul.f32 %v4105_v54, %v4105_v54  ;;  %v1315_v42 = vmul.f32 %v4109_v13, %v4109_v13  ;;  %v1564_v59 = vmul.f32 %v2751_v38, %v4121_v55  ;;  %v4138_v38 = vld [vmem:[%s3889_s13 + $0x68] sm:$0xff] }
 0x210   : > { %v1195_v7 = vpop.xlane.xlu0 %1194  ;;  %v1111_v21 = vpop.xlane.xlu1 %1110  ;;  %1898 = vperm.xlu1 %2697, %v1562_v60   ;;  %v1419_v60 = vmax.f32 %v1377_v43, 0.0  ;;  %v1605_v43 = vmul.f32 %v1563_v4, %v4029_v11  ;;  %4924 = vst [vmem:[#allocation77_spill] sm:$0xff] %v4138_v38 }
 0x211   : > { %1698 = vrot.lane.b32.xlu0 %v1604_v30, %s2801_s14  ;;  %v1294_v19 = vmul.f32 0.0051020407, %v1195_v7  ;;  %v1273_v46 = vmul.f32 0.0051020407, %v1111_v21  ;;  %v4118_v30 = vld [vmem:[%s3889_s13 + $0x108] sm:$0xff] }
 0x212   : > { %4923 = vst [vmem:[#allocation76_spill] sm:$0xff] %v4118_v30  ;;  %v1461_v31 = vadd.f32 1e-05, %v1419_v60  ;;  %v1440_v21 = vadd.f32 1e-05, %v1398_v12  ;;  %v1585_v15 = vmul.f32 %v2749_v37, %v4118_v30 }
 0x213   : > { %v1378_v7 = vsub.f32 %v1294_v19, %v1336_v1  ;;  %v1357_v25 = vsub.f32 %v1273_v46, %v1315_v42  ;;  %v4141_v42 = vld [vmem:[%s3889_s13 + $0x110] sm:$0xff] }
 0x214   : > { %v947_v52 = vpop.xlane.xlu1 %946  ;;  %v863_v48 = vpop.xlane.xlu0 %862  ;;  %1740 = vrot.lane.b32.xlu1 %v1625_v23, %s2801_s14  ;;  %2756 = vrsqrt.f32 %v1461_v31  ;;  %4925 = vst [vmem:[#allocation78_spill] sm:$0xff] %v4141_v42 }
 0x215   : > { %1903 = vperm.xlu0 %2696, %v1563_v4   ;;  %v4125_v33 = vmul.f32 0.0051020407, %v947_v52  ;;  %v4129_v23 = vmul.f32 0.0051020407, %v863_v48  ;;  %v1420_v60 = vmax.f32 %v1378_v7, 0.0  ;;  %2758 = vrsqrt.f32 %v1440_v21  ;;  %v2753_v52 = vpop.eup %2752 }
 0x216   : > { %v1399_v11 = vmax.f32 %v1357_v25, 0.0  ;;  %v1606_v48 = vmul.f32 %v1564_v59, %v4049_v45  ;;  %v2755_v46 = vpop.eup %2754  ;;  %v1627_v21 = vmul.f32 %v1585_v15, %v4045_v36 }
 0x217   : > { %v1337_v12 = vmul.f32 %v4125_v33, %v4125_v33  ;;  %v1316_v37 = vmul.f32 %v4129_v23, %v4129_v23  ;;  %v1565_v25 = vmul.f32 %v2755_v46, %v4138_v38  ;;  %v4158_v46 = vld [vmem:[%s3889_s13 + $0x118] sm:$0xff] }
 0x218   : > { %v1199_v14 = vpop.xlane.xlu1 %1198  ;;  %v1115_v2 = vpop.xlane.xlu0 %1114  ;;  %2008 = vperm.xlu1 %2697, %v1584_v58   ;;  %4926 = vst [vmem:[#allocation79_spill] sm:$0xff] %v4158_v46 }
 0x219   : > { %1742 = vrot.lane.b32.xlu0 %v1626_v50, %s2801_s14  ;;  %v1295_v19 = vmul.f32 0.0051020407, %v1199_v14  ;;  %v1274_v4 = vmul.f32 0.0051020407, %v1115_v2  ;;  %v1462_v14 = vadd.f32 1e-05, %v1420_v60 }
 0x21a   : > { %v1441_v2 = vadd.f32 1e-05, %v1399_v11 }
 0x21b   : > { %v1379_v31 = vsub.f32 %v1295_v19, %v1337_v12  ;;  %v1358_v7 = vsub.f32 %v1274_v4, %v1316_v37  ;;  %2760 = vrsqrt.f32 %v1462_v14  ;;  %v4161_v37 = vld [vmem:[%s3889_s13 + $0x70] sm:$0xff] }
 0x21c   : > { %v951_v58 = vpop.xlane.xlu0 %950  ;;  %v867_v5 = vpop.xlane.xlu1 %866  ;;  %1700 = vrot.lane.b32.xlu1 %v1605_v43, %s2801_s14  ;;  %v1586_v43 = vmul.f32 %v2753_v52, %v4141_v42  ;;  %2762 = vrsqrt.f32 %v1441_v2  ;;  %v1607_v2 = vmul.f32 %v1565_v25, %v4069_v63 }
 0x21d   : > { %2013 = vperm.xlu0 %2696, %v1585_v15   ;;  %v4145_v45 = vmul.f32 0.0051020407, %v951_v58  ;;  %v4149_v32 = vmul.f32 0.0051020407, %v867_v5  ;;  %v1421_v60 = vmax.f32 %v1379_v31, 0.0  ;;  %v1400_v36 = vmax.f32 %v1358_v7, 0.0 }
 0x21e   : > { %v2757_v58 = vpop.eup %2756  ;;  %v1628_v5 = vmul.f32 %v1586_v43, %v4065_v10 }
 0x21f   : > { %v1338_v11 = vmul.f32 %v4145_v45, %v4145_v45  ;;  %v2759_v4 = vpop.eup %2758  ;;  %v1317_v52 = vmul.f32 %v4149_v32, %v4149_v32  ;;  %v1587_v7 = vmul.f32 %v2757_v58, %v4158_v46 }
 0x220   : > { %v1203_v1 = vpop.xlane.xlu0 %1202  ;;  %v1119_v50 = vpop.xlane.xlu1 %1118  ;;  %1908 = vperm.xlu1 %2697, %v1564_v59  }
 0x221   : > { %1702 = vrot.lane.b32.xlu0 %v1606_v48, %s2801_s14  ;;  %v1296_v19 = vmul.f32 0.0051020407, %v1203_v1  ;;  %v1275_v15 = vmul.f32 0.0051020407, %v1119_v50  ;;  %v1463_v1 = vadd.f32 1e-05, %v1421_v60 }
 0x222   : > { %v1442_v50 = vadd.f32 1e-05, %v1400_v36 }
 0x223   : > { %v1380_v14 = vsub.f32 %v1296_v19, %v1338_v11  ;;  %v1359_v31 = vsub.f32 %v1275_v15, %v1317_v52  ;;  %2764 = vrsqrt.f32 %v1463_v1  ;;  %v4181_v52 = vld [vmem:[%s3889_s13 + $0x120] sm:$0xff] }
 0x224   : > { %v955_v59 = vpop.xlane.xlu1 %954  ;;  %v871_v30 = vpop.xlane.xlu0 %870  ;;  %1744 = vrot.lane.b32.xlu1 %v1627_v21, %s2801_s14  ;;  %v1566_v21 = vmul.f32 %v2759_v4, %v4161_v37  ;;  %2766 = vrsqrt.f32 %v1442_v50  ;;  %v4178_v4 = vld [vmem:[%s3889_s13 + $0x78] sm:$0xff]  ;;  %4928 = vst [vmem:[#allocation81_spill] sm:$0xff] %v4181_v52  ;;  %v1629_v50 = vmul.f32 %v1587_v7, %v4085_v26 }
 0x225   : > { %1913 = vperm.xlu0 %2696, %v1565_v25   ;;  %v4165_v10 = vmul.f32 0.0051020407, %v955_v59  ;;  %v4169_v38 = vmul.f32 0.0051020407, %v871_v30  ;;  %v1422_v60 = vmax.f32 %v1380_v14, 0.0  ;;  %v1401_v63 = vmax.f32 %v1359_v31, 0.0  ;;  %v2761_v59 = vpop.eup %2760 }
 0x226   : > { %v1608_v30 = vmul.f32 %v1566_v21, %v4089_v17  ;;  %v2763_v15 = vpop.eup %2762  ;;  %4927 = vst [vmem:[#allocation80_spill] sm:$0xff] %v4178_v4 }
 0x227   : > { %v1339_v36 = vmul.f32 %v4165_v10, %v4165_v10  ;;  %v1318_v58 = vmul.f32 %v4169_v38, %v4169_v38  ;;  %v1567_v31 = vmul.f32 %v2763_v15, %v4178_v4  ;;  %v4198_v15 = vld [vmem:[%s3889_s13 + $0x128] sm:$0xff] }
 0x228   : > { %v1207_v12 = vpop.xlane.xlu1 %1206  ;;  %v1123_v48 = vpop.xlane.xlu0 %1122  ;;  %2018 = vperm.xlu1 %2697, %v1586_v43  }
 0x229   : > { %1746 = vrot.lane.b32.xlu0 %v1628_v5, %s2801_s14  ;;  %v1297_v19 = vmul.f32 0.0051020407, %v1207_v12  ;;  %v1276_v25 = vmul.f32 0.0051020407, %v1123_v48  ;;  %v1464_v12 = vadd.f32 1e-05, %v1422_v60 }
 0x22a   : > { %v1443_v48 = vadd.f32 1e-05, %v1401_v63 }
 0x22b   : > { %v1381_v1 = vsub.f32 %v1297_v19, %v1339_v36  ;;  %v1360_v14 = vsub.f32 %v1276_v25, %v1318_v58  ;;  %2768 = vrsqrt.f32 %v1464_v12  ;;  %v4201_v58 = vld [vmem:[%s3889_s13 + $0x80] sm:$0xff] }
 0x22c   : > { %v959_v43 = vpop.xlane.xlu0 %958  ;;  %1704 = vrot.lane.b32.xlu1 %v1607_v2, %s2801_s14  ;;  %v875_v42 = vpop.xlane.xlu1 %874  ;;  %v1588_v2 = vmul.f32 %v2761_v59, %v4181_v52  ;;  %2770 = vrsqrt.f32 %v1443_v48  ;;  %v1609_v48 = vmul.f32 %v1567_v31, %v4109_v13 }
 0x22d   : > { %2023 = vperm.xlu0 %2696, %v1587_v7   ;;  %v4185_v17 = vmul.f32 0.0051020407, %v959_v43  ;;  %v1423_v60 = vmax.f32 %v1381_v1, 0.0  ;;  %v1402_v26 = vmax.f32 %v1360_v14, 0.0  ;;  %v2765_v43 = vpop.eup %2764 }
 0x22e   : > { %v2767_v59 = vpop.eup %2766 }
 0x22f   : > { %v1340_v25 = vmul.f32 %v4185_v17, %v4185_v17 }
 0x230   : > { %v1211_v11 = vpop.xlane.xlu0 %1210  ;;  %1918 = vperm.xlu1 %2697, %v1566_v21   ;;  %v1127_v5 = vpop.xlane.xlu1 %1126  ;;  %v4189_v21 = vmul.f32 0.0051020407, %v875_v42  ;;  %v1630_v42 = vmul.f32 %v1588_v2, %v4105_v54 }
 0x231   : > { %1706 = vrot.lane.b32.xlu0 %v1608_v30, %s2801_s14  ;;  %v1298_v19 = vmul.f32 0.0051020407, %v1211_v11  ;;  %v1277_v7 = vmul.f32 0.0051020407, %v1127_v5  ;;  %v1465_v11 = vadd.f32 1e-05, %v1423_v60 }
 0x232   : > { %v1319_v36 = vmul.f32 %v4189_v21, %v4189_v21  ;;  %v1444_v5 = vadd.f32 1e-05, %v1402_v26 }
 0x233   : > { %v1382_v12 = vsub.f32 %v1298_v19, %v1340_v25  ;;  %2772 = vrsqrt.f32 %v1465_v11 }
 0x234   : > { %1748 = vrot.lane.b32.xlu1 %v1629_v50, %s2801_s14  ;;  %v963_v46 = vpop.xlane.xlu1 %962  ;;  %v879_v63 = vpop.xlane.xlu0 %878  ;;  %v1361_v1 = vsub.f32 %v1277_v7, %v1319_v36  ;;  %v1589_v50 = vmul.f32 %v2765_v43, %v4198_v15  ;;  %2774 = vrsqrt.f32 %v1444_v5  ;;  %v4227_v36 = vld [vmem:[%s3889_s13 + $0x130] sm:$0xff] }
 0x235   : > { %1923 = vperm.xlu0 %2696, %v1567_v31   ;;  %v4205_v14 = vmul.f32 0.0051020407, %v963_v46  ;;  %v4209_v4 = vmul.f32 0.0051020407, %v879_v63  ;;  %v1424_v60 = vmax.f32 %v1382_v12, 0.0  ;;  %v2769_v31 = vpop.eup %2768 }
 0x236   : > { %v1403_v13 = vmax.f32 %v1361_v1, 0.0  ;;  %v2771_v7 = vpop.eup %2770 }
 0x237   : > { %v1341_v26 = vmul.f32 %v4205_v14, %v4205_v14  ;;  %v1320_v43 = vmul.f32 %v4209_v4, %v4209_v4 }
 0x238   : > { %2028 = vperm.xlu1 %2697, %v1588_v2   ;;  %v1215_v30 = vpop.xlane.xlu1 %1214  ;;  %v1131_v54 = vpop.xlane.xlu0 %1130  ;;  %v1568_v2 = vmul.f32 %v2767_v59, %v4201_v58  ;;  %v4224_v59 = vld [vmem:[%s3889_s13 + $0x88] sm:$0xff]  ;;  %v1445_v12 = vadd.f32 1e-05, %v1403_v13 }
 0x239   : > { %1750 = vrot.lane.b32.xlu0 %v1630_v42, %s2801_s14  ;;  %v1299_v19 = vmul.f32 0.0051020407, %v1215_v30  ;;  %v1278_v46 = vmul.f32 0.0051020407, %v1131_v54  ;;  %v1466_v30 = vadd.f32 1e-05, %v1424_v60  ;;  %v1569_v1 = vmul.f32 %v2771_v7, %v4224_v59 }
 0x23a   : > { %v1610_v63 = vmul.f32 %v1568_v2, %v4129_v23  ;;  %v1631_v23 = vmul.f32 %v1589_v50, %v4125_v33 }
 0x23b   : > { %v1383_v11 = vsub.f32 %v1299_v19, %v1341_v26  ;;  %v1362_v5 = vsub.f32 %v1278_v46, %v1320_v43  ;;  %2776 = vrsqrt.f32 %v1466_v30  ;;  %v1611_v30 = vmul.f32 %v1569_v1, %v4149_v32 }
 0x23c   : > { %1708 = vrot.lane.b32.xlu1 %v1609_v48, %s2801_s14  ;;  %v4212_v52 = vpop.permute.xlu1 %1720  ;;  %v1590_v48 = vmul.f32 %v2769_v31, %v4227_v36  ;;  %2778 = vrsqrt.f32 %v1445_v12  ;;  %v4242_v31 = vld [vmem:[%s3889_s13 + $0x138] sm:$0xff] }
 0x23d   : > { %2033 = vperm.xlu0 %2696, %v1589_v50   ;;  %v1425_v60 = vmax.f32 %v1383_v11, 0.0  ;;  %v1404_v19 = vmax.f32 %v1362_v5, 0.0  ;;  %v2773_v13 = vpop.eup %2772 }
 0x23e   : > { %v1632_v33 = vmul.f32 %v1590_v48, %v4145_v45  ;;  %v2775_v50 = vpop.eup %2774  ;;  %v1591_v11 = vmul.f32 %v2773_v13, %v4242_v31  ;;  %v4261_v13 = vld [vmem:[%s3889_s13 + $0x140] sm:$0xff] }
 0x23f   : > { %v1467_v7 = vadd.f32 1e-05, %v1425_v60  ;;  %v1446_v43 = vadd.f32 1e-05, %v1404_v19 }
 0x240   : > { %1928 = vperm.xlu1 %2697, %v1568_v2   ;;  %v4219_v25 = vpop.permute.xlu1 %1853  ;;  %v4221_v42 = vpop.permute.xlu0 %1848 }
 0x241   : > { %1710 = vrot.lane.b32.xlu0 %v1610_v63, %s2801_s14  ;;  %v4245_v63 = vld [vmem:[%s3889_s13 + $0x90] sm:$0xff]  ;;  %2780 = vrsqrt.f32 %v1467_v7 }
 0x242   : > { %v1570_v45 = vmul.f32 %v2775_v50, %v4245_v63  ;;  %2782 = vrsqrt.f32 %v1446_v43 }
 0x244   : > { %1752 = vrot.lane.b32.xlu1 %v1631_v23, %s2801_s14  ;;  %v4234_v54 = vpop.permute.xlu1 %1958  ;;  %v4236_v2 = vpop.permute.xlu0 %1953 }
 0x245   : > { %4929 = vst [vmem:[#allocation82_spill] sm:$0xff] %v4236_v2  ;;  %1933 = vperm.xlu0 %2696, %v1569_v1   ;;  %v2777_v23 = vpop.eup %2776  ;;  %v4258_v1 = vld [vmem:[%s3889_s13 + $0x98] sm:$0xff]  ;;  %v4274_v2 = vld [vmem:[%s3889_s13 + $0x148] sm:$0xff] }
 0x246   : > { %v2779_v60 = vpop.eup %2778  ;;  %v1592_v7 = vmul.f32 %v2777_v23, %v4261_v13 }
 0x247   : > { %v1571_v50 = vmul.f32 %v2779_v60, %v4258_v1 }
 0x248   : > { %2038 = vperm.xlu1 %2697, %v1590_v48   ;;  %v1681_v46 = vpop.permute.xlu1 %1680  ;;  %v4239_v26 = vpop.permute.xlu0 %1678  ;;  %v1612_v48 = vmul.f32 %v1570_v45, %v4169_v38 }
 0x249   : > { %1754 = vrot.lane.b32.xlu0 %v1632_v33, %s2801_s14  ;;  %v1633_v33 = vmul.f32 %v1591_v11, %v4165_v10  ;;  %v4277_v10 = vld [vmem:[%s3889_s13 + $0xa0] sm:$0xff] }
 0x24c   : > { %1712 = vrot.lane.b32.xlu1 %v1611_v30, %s2801_s14  ;;  %v4252_v12 = vpop.permute.xlu1 %1858  ;;  %v1723_v5 = vpop.permute.xlu0 %1722 }
 0x24d   : > { %4930 = vst [vmem:[#allocation83_spill] sm:$0xff] %v4252_v12  ;;  %2043 = vperm.xlu0 %2696, %v1591_v11   ;;  %v2781_v30 = vpop.eup %2780  ;;  %v1613_v11 = vmul.f32 %v1571_v50, %v4189_v21  ;;  %v2802_v21 = vmov 1  }
 0x24e   : > { %v1593_v23 = vmul.f32 %v2781_v30, %v4274_v2 }
 0x250   : > { %1938 = vperm.xlu1 %2697, %v1570_v45   ;;  %v1683_v19 = vpop.permute.xlu1 %1682  ;;  %v4255_v32 = vpop.permute.xlu0 %1963  ;;  %v1634_v45 = vmul.f32 %v1592_v7, %v4185_v17 }
 0x251   : > { %4931 = vst [vmem:[#allocation84_spill] sm:$0xff] %v4255_v32  ;;  %1714 = vrot.lane.b32.xlu0 %v1612_v48, %s2801_s14  ;;  %v2783_v32 = vpop.eup %2782 }
 0x252   : > { %v1572_v60 = vmul.f32 %v2783_v32, %v4277_v10  ;;  %v1635_v32 = vmul.f32 %v1593_v23, %v4205_v14 }
 0x254   : > { %1756 = vrot.lane.b32.xlu1 %v1633_v33, %s2801_s14  ;;  %v1725_v38 = vpop.permute.xlu1 %1724  ;;  %v4268_v43 = vpop.permute.xlu0 %1863 }
 0x255   : > { %4932 = vst [vmem:[#allocation85_spill] sm:$0xff] %v4268_v43  ;;  %1943 = vperm.xlu0 %2696, %v1571_v50   ;;  %v2784_v50 = vld [vmem:[%s3889_s13 + $0x8] sm:$0xff] }
 0x256   : > { %v1805_v30 = vsub.f32 %v2784_v50, %v1681_v46  ;;  %v2787_v46 = vld [vmem:[%s3889_s13 + $0xa8] sm:$0xff] }
 0x258   : > { %2048 = vperm.xlu1 %2697, %v1592_v7   ;;  %v4271_v12 = vpop.permute.xlu1 %1968  ;;  %v1727_v48 = vpop.permute.xlu0 %1726  ;;  %v1614_v7 = vmul.f32 %v1572_v60, %v4209_v4  ;;  %v2785_v4 = vld [vmem:[%s3889_s13] sm:$0xff] }
 0x259   : > { %4933 = vst [vmem:[#allocation86_spill] sm:$0xff] %v4271_v12  ;;  %1758 = vrot.lane.b32.xlu0 %v1634_v45, %s2801_s14 }
 0x25c   : > { %1716 = vrot.lane.b32.xlu1 %v1613_v11, %s2801_s14  ;;  %v1685_v17 = vpop.permute.xlu1 %1684  ;;  %v4284_v33 = vpop.permute.xlu0 %1973 }
 0x25d   : > { %4934 = vst [vmem:[#allocation87_spill] sm:$0xff] %v4284_v33  ;;  %2053 = vperm.xlu0 %2696, %v1593_v23   ;;  %v1825_v23 = vsub.f32 %v2787_v46, %v4212_v52 }
 0x260   : > { %v4287_v43 = vpop.permute.xlu1 %1868  ;;  %1948 = vperm.xlu1 %2697, %v1572_v60   ;;  %v1687_v45 = vpop.permute.xlu0 %1686  ;;  %v1804_v60 = vsub.f32 %v2785_v4, %v4239_v26 }
 0x261   : > { %4935 = vst [vmem:[#allocation88_spill] sm:$0xff] %v4287_v43  ;;  %1718 = vrot.lane.b32.xlu0 %v1614_v7, %s2801_s14  ;;  %v2786_v43 = vld [vmem:[%s3889_s13 + $0xb0] sm:$0xff] }
 0x262   : > { %2699 = vset.pattern.permute.xlu0 %v2802_v21  ;;  %v1826_v7 = vsub.f32 %v2786_v43, %v1723_v5  ;;  %v1808_v5 = vsub.f32 %v3961_v3, %v1687_v45  ;;  %v2790_v3 = vld [vmem:[%s3889_s13 + $0x18] sm:$0xff] }
 0x264   : > { %v1729_v11 = vpop.permute.xlu1 %1728  ;;  %1760 = vrot.lane.b32.xlu1 %v1635_v32, %s2801_s14  ;;  %v4293_v33 = vpop.permute.xlu0 %1873  ;;  %v1828_v32 = vsub.f32 %v3943_v24, %v1727_v48 }
 0x265   : > { %2147 = vperm.xlu0 %2699, %v1805_v30   ;;  %2698 = vset.pattern.permute.xlu1 %v2802_v21  ;;  %v2788_v30 = vld [vmem:[%s3889_s13 + $0x10] sm:$0xff] }
 0x266   : > { %v1806_v26 = vsub.f32 %v2788_v30, %v1683_v19  ;;  %v1807_v19 = vsub.f32 %v2790_v3, %v1685_v17  ;;  %v4937_v3 = vld [vmem:[#allocation35_spill] sm:$0xff] }
 0x268   : > { %v4298_v12 = vpop.permute.xlu1 %1978  ;;  %2142 = vperm.xlu1 %2698, %v1804_v60   ;;  %v1731_v14 = vpop.permute.xlu0 %1730  ;;  %v2789_v60 = vld [vmem:[%s3889_s13 + $0xb8] sm:$0xff] }
 0x269   : > { %2252 = vperm.xlu0 %2699, %v1826_v7   ;;  %v1827_v7 = vsub.f32 %v2789_v60, %v1725_v38  ;;  %v1830_v52 = vsub.f32 %v3981_v8, %v1731_v14  ;;  %v1829_v8 = vsub.f32 %v3958_v41, %v1729_v11 }
 0x26c   : > { %v1689_v50 = vpop.permute.xlu1 %1688  ;;  %2247 = vperm.xlu1 %2698, %v1825_v23   ;;  %v4303_v21 = vpop.permute.xlu0 %1983 }
 0x26d   : > { %2262 = vperm.xlu0 %2699, %v1828_v32  }
 0x270   : > { %v4307_v43 = vpop.permute.xlu1 %1878  ;;  %2152 = vperm.xlu1 %2698, %v1806_v26   ;;  %v1691_v4 = vpop.permute.xlu0 %1690 }
 0x271   : > { %2162 = vperm.xlu0 %2699, %v1808_v5   ;;  %v1810_v45 = vsub.f32 %v4001_v51, %v1691_v4  ;;  %v1809_v51 = vsub.f32 %v3978_v49, %v1689_v50 }
 0x274   : > { %v1733_v24 = vpop.permute.xlu1 %1732  ;;  %2257 = vperm.xlu1 %2698, %v1827_v7   ;;  %v1884_v48 = vpop.permute.xlu0 %1883 }
 0x275   : > { %v4312_v46 = vmul.f32 %v1884_v48, %v3338_v22  ;;  %v4315_v23 = vmul.f32 %v1884_v48, %v3344_v27  ;;  %2272 = vperm.xlu0 %2699, %v1830_v52  }
 0x278   : > { %v4319_v32 = vpop.permute.xlu1 %1988  ;;  %2157 = vperm.xlu1 %2698, %v1807_v19   ;;  %v1735_v38 = vpop.permute.xlu0 %1734 }
 0x279   : > { %2172 = vperm.xlu0 %2699, %v1810_v45   ;;  %v1832_v14 = vsub.f32 %v4021_v35, %v1735_v38  ;;  %v4938_v45 = vld [vmem:[#allocation32_spill] sm:$0xff] }
 0x27c   : > { %v1693_v30 = vpop.permute.xlu1 %1692  ;;  %2267 = vperm.xlu1 %2698, %v1829_v8   ;;  %v1994_v22 = vpop.permute.xlu0 %1993 }
 0x27d   : > { %v4324_v27 = vmul.f32 %v1994_v22, %v3372_v57  ;;  %v4327_v26 = vmul.f32 %v1994_v22, %v3380_v0  ;;  %2282 = vperm.xlu0 %2699, %v1832_v14   ;;  %v1831_v57 = vsub.f32 %v3998_v62, %v1733_v24  ;;  %v4940_v22 = vld [vmem:[#allocation36_spill] sm:$0xff] }
 0x280   : > { %v1889_v17 = vpop.permute.xlu1 %1888  ;;  %2167 = vperm.xlu1 %2698, %v1809_v51   ;;  %v1695_v5 = vpop.permute.xlu0 %1694 }
 0x281   : > { %v4331_v4 = vmul.f32 %v1889_v17, %v3370_v56  ;;  %v4334_v41 = vmul.f32 %v1889_v17, %v3378_v6  ;;  %v1812_v35 = vsub.f32 %v4041_v40, %v1695_v5  ;;  %v1811_v56 = vsub.f32 %v4018_v34, %v1693_v30  ;;  %v4936_v34 = vld [vmem:[#allocation33_spill] sm:$0xff]  ;;  %v4941_v17 = vld [vmem:[#allocation38_spill] sm:$0xff] }
 0x283   : > { %2182 = vperm.xlu0 %2699, %v1812_v35  }
 0x284   : > { %v1737_v11 = vpop.permute.xlu1 %1736  ;;  %2277 = vperm.xlu1 %2698, %v1831_v57   ;;  %v1894_v0 = vpop.permute.xlu0 %1893 }
 0x285   : > { %v4339_v60 = vmul.f32 %v1894_v0, %v3404_v9  ;;  %v4342_v49 = vmul.f32 %v1894_v0, %v3412_v20  ;;  %v1833_v52 = vsub.f32 %v4038_v47, %v1737_v11  ;;  %v4942_v11 = vld [vmem:[#allocation37_spill] sm:$0xff] }
 0x288   : > { %v1999_v50 = vpop.permute.xlu1 %1998  ;;  %2177 = vperm.xlu1 %2698, %v1811_v56   ;;  %v1739_v6 = vpop.permute.xlu0 %1738  ;;  %v4943_v56 = vld [vmem:[#allocation39_spill] sm:$0xff] }
 0x289   : > { %v4346_v7 = vmul.f32 %v1999_v50, %v3406_v53  ;;  %v4349_v62 = vmul.f32 %v1999_v50, %v3414_v61  ;;  %v1834_v40 = vsub.f32 %v4061_v16, %v1739_v6  ;;  %v4939_v16 = vld [vmem:[#allocation34_spill] sm:$0xff] }
 0x28b   : > { %2292 = vperm.xlu0 %2699, %v1834_v40  }
 0x28c   : > { %v1697_v9 = vpop.permute.xlu1 %1696  ;;  %2287 = vperm.xlu1 %2698, %v1833_v52   ;;  %v2004_v20 = vpop.permute.xlu0 %2003  ;;  %v4944_v52 = vld [vmem:[#allocation41_spill] sm:$0xff] }
 0x28d   : > { %v1813_v24 = vsub.f32 %v4058_v18, %v1697_v9  ;;  %v4355_v48 = vmul.f32 %v2004_v20, %v4936_v34  ;;  %v4358_v19 = vmul.f32 %v2004_v20, %v4937_v3  ;;  %v4945_v20 = vld [vmem:[#allocation43_spill] sm:$0xff] }
 0x290   : > { %v1899_v53 = vpop.permute.xlu1 %1898  ;;  %2187 = vperm.xlu1 %2698, %v1813_v24   ;;  %v1699_v61 = vpop.permute.xlu0 %1698 }
 0x291   : > { %v4361_v38 = vmul.f32 %v1899_v53, %v4938_v45  ;;  %v4364_v47 = vmul.f32 %v1899_v53, %v4939_v16  ;;  %v1814_v8 = vsub.f32 %v4081_v44, %v1699_v61  ;;  %v4946_v53 = vld [vmem:[#allocation40_spill] sm:$0xff]  ;;  %v4947_v45 = vld [vmem:[#allocation42_spill] sm:$0xff] }
 0x293   : > { %2192 = vperm.xlu0 %2699, %v1814_v8  }
 0x294   : > { %v1741_v14 = vpop.permute.xlu1 %1740  ;;  %v1904_v18 = vpop.permute.xlu0 %1903 }
 0x295   : > { %v1835_v30 = vsub.f32 %v4078_v29, %v1741_v14  ;;  %v4369_v51 = vmul.f32 %v1904_v18, %v4940_v22  ;;  %v4372_v5 = vmul.f32 %v1904_v18, %v4941_v17  ;;  %v4948_v14 = vld [vmem:[#allocation76_spill] sm:$0xff]  ;;  %v4950_v17 = vld [vmem:[#allocation46_spill] sm:$0xff] }
 0x297   : > { %2297 = vperm.xlu1 %2698, %v1835_v30   ;;  %v4949_v30 = vld [vmem:[#allocation44_spill] sm:$0xff] }
 0x298   : > { %v2009_v35 = vpop.permute.xlu1 %2008  ;;  %v1743_v57 = vpop.permute.xlu0 %1742 }
 0x299   : > { %v4375_v0 = vmul.f32 %v2009_v35, %v4942_v11  ;;  %v4378_v50 = vmul.f32 %v2009_v35, %v4943_v56  ;;  %v1836_v44 = vsub.f32 %v4101_v39, %v1743_v57  ;;  %v4951_v56 = vld [vmem:[#allocation45_spill] sm:$0xff] }
 0x29b   : > { %2302 = vperm.xlu0 %2699, %v1836_v44  }
 0x29c   : > { %v1701_v6 = vpop.permute.xlu1 %1700  ;;  %v2014_v29 = vpop.permute.xlu0 %2013 }
 0x29d   : > { %v1815_v40 = vsub.f32 %v4098_v28, %v1701_v6  ;;  %v4383_v9 = vmul.f32 %v2014_v29, %v4944_v52  ;;  %v4386_v24 = vmul.f32 %v2014_v29, %v4945_v20  ;;  %v4952_v6 = vld [vmem:[#allocation47_spill] sm:$0xff] }
 0x29f   : > { %2197 = vperm.xlu1 %2698, %v1815_v40  }
 0x2a0   : > { %v1909_v34 = vpop.permute.xlu1 %1908  ;;  %v1703_v3 = vpop.permute.xlu0 %1702 }
 0x2a1   : > { %v4389_v61 = vmul.f32 %v1909_v34, %v4946_v53  ;;  %v4392_v16 = vmul.f32 %v1909_v34, %v4947_v45  ;;  %v1816_v39 = vsub.f32 %v4121_v55, %v1703_v3  ;;  %v4953_v55 = vld [vmem:[#allocation78_spill] sm:$0xff]  ;;  %v4954_v34 = vld [vmem:[#allocation77_spill] sm:$0xff] }
 0x2a2   : > { %v4955_v53 = vld [vmem:[#allocation49_spill] sm:$0xff] }
 0x2a3   : > { %2202 = vperm.xlu0 %2699, %v1816_v39   ;;  %v4957_v39 = vld [vmem:[#allocation51_spill] sm:$0xff] }
 0x2a4   : > { %v1745_v8 = vpop.permute.xlu1 %1744  ;;  %v1914_v28 = vpop.permute.xlu0 %1913 }
 0x2a5   : > { %v1837_v18 = vsub.f32 %v4948_v14, %v1745_v8  ;;  %v4397_v22 = vmul.f32 %v1914_v28, %v4949_v30  ;;  %v4400_v35 = vmul.f32 %v1914_v28, %v4950_v17  ;;  %v4960_v17 = vld [vmem:[#allocation50_spill] sm:$0xff] }
 0x2a7   : > { %2307 = vperm.xlu1 %2698, %v1837_v18   ;;  %v4959_v18 = vld [vmem:[#allocation48_spill] sm:$0xff] }
 0x2a8   : > { %v2019_v57 = vpop.permute.xlu1 %2018  ;;  %v1747_v11 = vpop.permute.xlu0 %1746 }
 0x2a9   : > { %v4403_v44 = vmul.f32 %v2019_v57, %v4951_v56  ;;  %v4406_v29 = vmul.f32 %v2019_v57, %v4952_v6  ;;  %v1838_v40 = vsub.f32 %v4953_v55, %v1747_v11  ;;  %v4961_v55 = vld [vmem:[#allocation79_spill] sm:$0xff] }
 0x2ab   : > { %2312 = vperm.xlu0 %2699, %v1838_v40  }
 0x2ac   : > { %v1705_v52 = vpop.permute.xlu1 %1704  ;;  %v2024_v20 = vpop.permute.xlu0 %2023 }
 0x2ad   : > { %v1817_v3 = vsub.f32 %v4954_v34, %v1705_v52  ;;  %v4411_v45 = vmul.f32 %v2024_v20, %v4955_v53  ;;  %v4414_v8 = vmul.f32 %v2024_v20, %v4957_v39  ;;  %v4962_v52 = vld [vmem:[#allocation52_spill] sm:$0xff]  ;;  %v4964_v20 = vld [vmem:[#allocation54_spill] sm:$0xff] }
 0x2af   : > { %4956 = vst [vmem:[#allocation33_spill] sm:$0xff] %v4411_v45  ;;  %4958 = vst [vmem:[#allocation35_spill] sm:$0xff] %v4414_v8  ;;  %2207 = vperm.xlu1 %2698, %v1817_v3  }
 0x2b0   : > { %v1919_v28 = vpop.permute.xlu1 %1918  ;;  %v1707_v14 = vpop.permute.xlu0 %1706 }
 0x2b1   : > { %v4417_v30 = vmul.f32 %v1919_v28, %v4959_v18  ;;  %v4420_v57 = vmul.f32 %v1919_v28, %v4960_v17  ;;  %v1818_v11 = vsub.f32 %v4161_v37, %v1707_v14  ;;  %v4966_v18 = vld [vmem:[#allocation53_spill] sm:$0xff]  ;;  %v4968_v28 = vld [vmem:[#allocation55_spill] sm:$0xff] }
 0x2b2   : > { %v4969_v37 = vld [vmem:[#allocation81_spill] sm:$0xff] }
 0x2b3   : > { %2212 = vperm.xlu0 %2699, %v1818_v11  }
 0x2b4   : > { %v1749_v56 = vpop.permute.xlu1 %1748  ;;  %v1924_v6 = vpop.permute.xlu0 %1923 }
 0x2b5   : > { %v1839_v40 = vsub.f32 %v4961_v55, %v1749_v56  ;;  %v4425_v34 = vmul.f32 %v1924_v6, %v4962_v52  ;;  %v4428_v3 = vmul.f32 %v1924_v6, %v4964_v20  ;;  %v4970_v55 = vld [vmem:[#allocation80_spill] sm:$0xff]  ;;  %v4973_v6 = vld [vmem:[#allocation59_spill] sm:$0xff] }
 0x2b7   : > { %4963 = vst [vmem:[#allocation32_spill] sm:$0xff] %v4425_v34  ;;  %4965 = vst [vmem:[#allocation34_spill] sm:$0xff] %v4428_v3  ;;  %2317 = vperm.xlu1 %2698, %v1839_v40   ;;  %v4971_v34 = vld [vmem:[#allocation57_spill] sm:$0xff]  ;;  %v4975_v3 = vld [vmem:[#allocation56_spill] sm:$0xff] }
 0x2b8   : > { %v2029_v53 = vpop.permute.xlu1 %2028  ;;  %v1751_v39 = vpop.permute.xlu0 %1750 }
 0x2b9   : > { %v4431_v8 = vmul.f32 %v2029_v53, %v4966_v18  ;;  %v4434_v17 = vmul.f32 %v2029_v53, %v4968_v28  ;;  %v1840_v14 = vsub.f32 %v4969_v37, %v1751_v39  ;;  %v4976_v53 = vld [vmem:[#allocation58_spill] sm:$0xff] }
 0x2bb   : > { %4967 = vst [vmem:[#allocation36_spill] sm:$0xff] %v4431_v8  ;;  %2322 = vperm.xlu0 %2699, %v1840_v14  }
 0x2bc   : > { %v1709_v11 = vpop.permute.xlu1 %1708  ;;  %v2034_v56 = vpop.permute.xlu0 %2033 }
 0x2bd   : > { %v1819_v52 = vsub.f32 %v4970_v55, %v1709_v11  ;;  %v4439_v45 = vmul.f32 %v2034_v56, %v4971_v34  ;;  %v4442_v40 = vmul.f32 %v2034_v56, %v4973_v6  ;;  %v4977_v11 = vld [vmem:[#allocation60_spill] sm:$0xff]  ;;  %v4979_v56 = vld [vmem:[#allocation62_spill] sm:$0xff] }
 0x2bf   : > { %4972 = vst [vmem:[#allocation38_spill] sm:$0xff] %v4439_v45  ;;  %4974 = vst [vmem:[#allocation37_spill] sm:$0xff] %v4442_v40  ;;  %2217 = vperm.xlu1 %2698, %v1819_v52   ;;  %v4981_v40 = vld [vmem:[#allocation61_spill] sm:$0xff] }
 0x2c0   : > { %v1929_v20 = vpop.permute.xlu1 %1928  ;;  %v1711_v18 = vpop.permute.xlu0 %1710 }
 0x2c1   : > { %v4445_v8 = vmul.f32 %v1929_v20, %v4975_v3  ;;  %v4448_v28 = vmul.f32 %v1929_v20, %v4976_v53  ;;  %v1820_v39 = vsub.f32 %v4201_v58, %v1711_v18  ;;  %v4982_v20 = vld [vmem:[#allocation63_spill] sm:$0xff] }
 0x2c3   : > { %2222 = vperm.xlu0 %2699, %v1820_v39  }
 0x2c4   : > { %v1753_v37 = vpop.permute.xlu1 %1752  ;;  %v1934_v14 = vpop.permute.xlu0 %1933 }
 0x2c5   : > { %v1841_v34 = vsub.f32 %v4198_v15, %v1753_v37  ;;  %v4453_v55 = vmul.f32 %v1934_v14, %v4977_v11  ;;  %v4456_v52 = vmul.f32 %v1934_v14, %v4979_v56  ;;  %v4983_v37 = vld [vmem:[#allocation65_spill] sm:$0xff]  ;;  %v4985_v14 = vld [vmem:[#allocation67_spill] sm:$0xff] }
 0x2c7   : > { %4978 = vst [vmem:[#allocation39_spill] sm:$0xff] %v4453_v55  ;;  %4980 = vst [vmem:[#allocation41_spill] sm:$0xff] %v4456_v52  ;;  %2327 = vperm.xlu1 %2698, %v1841_v34   ;;  %v4987_v52 = vld [vmem:[#allocation64_spill] sm:$0xff] }
 0x2c8   : > { %v2039_v6 = vpop.permute.xlu1 %2038  ;;  %v1755_v3 = vpop.permute.xlu0 %1754 }
 0x2c9   : > { %v4459_v45 = vmul.f32 %v2039_v6, %v4981_v40  ;;  %v4462_v53 = vmul.f32 %v2039_v6, %v4982_v20  ;;  %v1842_v58 = vsub.f32 %v4227_v36, %v1755_v3  ;;  %v4988_v6 = vld [vmem:[#allocation66_spill] sm:$0xff] }
 0x2cb   : > { %2332 = vperm.xlu0 %2699, %v1842_v58  }
 0x2cc   : > { %v1713_v18 = vpop.permute.xlu1 %1712  ;;  %v2044_v15 = vpop.permute.xlu0 %2043 }
 0x2cd   : > { %v1821_v39 = vsub.f32 %v4224_v59, %v1713_v18  ;;  %v4467_v11 = vmul.f32 %v2044_v15, %v4983_v37  ;;  %v4470_v34 = vmul.f32 %v2044_v15, %v4985_v14  ;;  %v4989_v18 = vld [vmem:[#allocation69_spill] sm:$0xff] }
 0x2cf   : > { %4984 = vst [vmem:[#allocation43_spill] sm:$0xff] %v4467_v11  ;;  %4986 = vst [vmem:[#allocation40_spill] sm:$0xff] %v4470_v34  ;;  %2227 = vperm.xlu1 %2698, %v1821_v39   ;;  %v4991_v39 = vld [vmem:[#allocation70_spill] sm:$0xff]  ;;  %v4992_v34 = vld [vmem:[#allocation68_spill] sm:$0xff] }
 0x2d0   : > { %v1939_v56 = vpop.permute.xlu1 %1938  ;;  %v1715_v40 = vpop.permute.xlu0 %1714 }
 0x2d1   : > { %v4473_v55 = vmul.f32 %v1939_v56, %v4987_v52  ;;  %v4476_v20 = vmul.f32 %v1939_v56, %v4988_v6  ;;  %v1822_v36 = vsub.f32 %v4245_v63, %v1715_v40  ;;  %v4994_v6 = vld [vmem:[#allocation71_spill] sm:$0xff] }
 0x2d3   : > { %2232 = vperm.xlu0 %2699, %v1822_v36  }
 0x2d4   : > { %v1757_v3 = vpop.permute.xlu1 %1756  ;;  %v1944_v59 = vpop.permute.xlu0 %1943 }
 0x2d5   : > { %v1843_v58 = vsub.f32 %v4242_v31, %v1757_v3  ;;  %v4481_v15 = vmul.f32 %v1944_v59, %v4989_v18  ;;  %v4484_v37 = vmul.f32 %v1944_v59, %v4991_v39  ;;  %v4996_v3 = vld [vmem:[#allocation72_spill] sm:$0xff]  ;;  %v4998_v18 = vld [vmem:[#allocation75_spill] sm:$0xff]  ;;  %v5000_v39 = vld [vmem:[#allocation73_spill] sm:$0xff] }
 0x2d7   : > { %4990 = vst [vmem:[#allocation42_spill] sm:$0xff] %v4481_v15  ;;  %2337 = vperm.xlu1 %2698, %v1843_v58  }
 0x2d8   : > { %v2049_v52 = vpop.permute.xlu1 %2048  ;;  %v1759_v14 = vpop.permute.xlu0 %1758 }
 0x2d9   : > { %v4487_v56 = vmul.f32 %v2049_v52, %v4992_v34  ;;  %v4490_v63 = vmul.f32 %v2049_v52, %v4994_v6 }
 0x2db   : > { %4993 = vst [vmem:[#allocation76_spill] sm:$0xff] %v4487_v56  ;;  %4995 = vst [vmem:[#allocation44_spill] sm:$0xff] %v4490_v63  ;;  %v5001_v56 = vld [vmem:[#allocation74_spill] sm:$0xff] }
 0x2dc   : > { %v1717_v40 = vpop.permute.xlu1 %1716  ;;  %v2054_v36 = vpop.permute.xlu0 %2053  ;;  %v5003_v63 = vld [vmem:[#allocation6_spill] sm:$0xff] }
 0x2dd   : > { %v1823_v31 = vsub.f32 %v4258_v1, %v1717_v40  ;;  %v4494_v11 = vmul.f32 %v2054_v36, %v4996_v3  ;;  %v4497_v15 = vmul.f32 %v2054_v36, %v4998_v18  ;;  %v2058_v1 = vmul.f32 %v4219_v25, %v5003_v63  ;;  %v5004_v40 = vld [vmem:[#allocation8_spill] sm:$0xff]  ;;  %v5005_v63 = vld [vmem:[#allocation2_spill] sm:$0xff] }
 0x2de   : > { %v2059_v3 = vmul.f32 %v4219_v25, %v5004_v40  ;;  %v5006_v25 = vld [vmem:[#allocation4_spill] sm:$0xff] }
 0x2df   : > { %4997 = vst [vmem:[#allocation46_spill] sm:$0xff] %v4494_v11  ;;  %4999 = vst [vmem:[#allocation45_spill] sm:$0xff] %v4497_v15  ;;  %2237 = vperm.xlu1 %2698, %v1823_v31   ;;  %v5008_v15 = vld [vmem:[#allocation9_spill] sm:$0xff] }
 0x2e0   : > { %v1949_v59 = vpop.permute.xlu1 %1948  ;;  %v1719_v58 = vpop.permute.xlu0 %1718  ;;  %v2101_v11 = vmul.f32 %v4234_v54, %v5008_v15  ;;  %v5012_v15 = vld [vmem:[#allocation15_spill] sm:$0xff] }
 0x2e1   : > { %v4501_v34 = vmul.f32 %v1949_v59, %v5000_v39  ;;  %v4504_v52 = vmul.f32 %v1949_v59, %v5001_v56  ;;  %v1824_v6 = vsub.f32 %v4277_v10, %v1719_v58  ;;  %v1844_v56 = vsub.f32 %v4261_v13, %v1759_v14 }
 0x2e2   : > { %v2056_v58 = vmul.f32 %v4221_v42, %v5005_v63  ;;  %v2057_v39 = vmul.f32 %v4221_v42, %v5006_v25  ;;  %v5011_v25 = vld [vmem:[#allocation5_spill] sm:$0xff] }
 0x2e3   : > { %5002 = vst [vmem:[#allocation47_spill] sm:$0xff] %v4504_v52  ;;  %2242 = vperm.xlu0 %2699, %v1824_v6   ;;  %v5007_v6 = vld [vmem:[#allocation7_spill] sm:$0xff]  ;;  %v5014_v52 = vld [vmem:[#allocation17_spill] sm:$0xff] }
 0x2e4   : > { %v1761_v36 = vpop.permute.xlu1 %1760  ;;  %v2148_v31 = vpop.permute.xlu0 %2147  ;;  %v2100_v40 = vmul.f32 %v4234_v54, %v5007_v6 }
 0x2e5   : > { %v1845_v10 = vsub.f32 %v4274_v2, %v1761_v36  ;;  %v2352_v18 = vadd.f32 %v2148_v31, %v2058_v1  ;;  %v2353_v59 = vadd.f32 %v2148_v31, %v2059_v3  ;;  %v5009_v36 = vld [vmem:[#allocation3_spill] sm:$0xff]  ;;  %v5010_v31 = vld [vmem:[#allocation82_spill] sm:$0xff] }
 0x2e6   : > { %v2098_v63 = vmul.f32 %v5010_v31, %v5009_v36  ;;  %v2099_v54 = vmul.f32 %v5010_v31, %v5011_v25  ;;  %v5017_v31 = vld [vmem:[#allocation12_spill] sm:$0xff] }
 0x2e7   : > { %2436 = vst [vmem:[%s4514_s20 + $0x10] sm:$0xff] %v2352_v18  ;;  %2437 = vst.msk [vmem:[%s4514_s20 + $0x18] sm:$0xff] %vm795_vm1, %v2353_v59  ;;  %2347 = vperm.xlu1 %2698, %v1845_v10   ;;  %2342 = vperm.xlu0 %2699, %v1844_v56   ;;  %v5013_v18 = vld [vmem:[#allocation86_spill] sm:$0xff]  ;;  %v5019_v25 = vld [vmem:[#allocation88_spill] sm:$0xff] }
 0x2e8   : > { %v2143_v2 = vpop.permute.xlu1 %2142  ;;  %v2253_v13 = vpop.permute.xlu0 %2252  ;;  %v2104_v6 = vmul.f32 %v5013_v18, %v5012_v15  ;;  %v2105_v10 = vmul.f32 %v5013_v18, %v5014_v52 }
 0x2e9   : > { %v2350_v14 = vadd.f32 %v2143_v2, %v2056_v58  ;;  %v2351_v1 = vadd.f32 %v2143_v2, %v2057_v39  ;;  %v2394_v42 = vadd.f32 %v2253_v13, %v2100_v40  ;;  %v2395_v3 = vadd.f32 %v2253_v13, %v2101_v11  ;;  %v5015_v2 = vld [vmem:[#allocation10_spill] sm:$0xff]  ;;  %v5016_v13 = vld [vmem:[#allocation83_spill] sm:$0xff] }
 0x2ea   : > { %v2060_v36 = vmul.f32 %v5016_v13, %v5015_v2  ;;  %v2061_v52 = vmul.f32 %v5016_v13, %v5017_v31  ;;  %v5023_v13 = vld [vmem:[#allocation13_spill] sm:$0xff] }
 0x2eb   : > { %2434 = vst [vmem:[%s4514_s20] sm:$0xff] %v2350_v14  ;;  %2435 = vst.msk [vmem:[%s4514_s20 + $0x8] sm:$0xff] %vm795_vm1, %v2351_v1  ;;  %v5018_v14 = vld [vmem:[#allocation18_spill] sm:$0xff]  ;;  %v5020_v1 = vld [vmem:[#allocation20_spill] sm:$0xff] }
 0x2ec   : > { %2478 = vst [vmem:[%s4514_s20 + $0x160] sm:$0xff] %v2394_v42  ;;  %2479 = vst.msk [vmem:[%s4514_s20 + $0x168] sm:$0xff] %vm795_vm1, %v2395_v3  ;;  %v2248_v11 = vpop.permute.xlu1 %2247  ;;  %v2263_v56 = vpop.permute.xlu0 %2262  ;;  %v2064_v15 = vmul.f32 %v5019_v25, %v5018_v14  ;;  %v2065_v42 = vmul.f32 %v5019_v25, %v5020_v1 }
 0x2ed   : > { %v2392_v59 = vadd.f32 %v2248_v11, %v2098_v63  ;;  %v2393_v58 = vadd.f32 %v2248_v11, %v2099_v54  ;;  %v2398_v39 = vadd.f32 %v2263_v56, %v2104_v6  ;;  %v2399_v40 = vadd.f32 %v2263_v56, %v2105_v10  ;;  %v5021_v11 = vld [vmem:[#allocation11_spill] sm:$0xff]  ;;  %v5022_v56 = vld [vmem:[#allocation84_spill] sm:$0xff] }
 0x2ee   : > { %v2102_v2 = vmul.f32 %v5022_v56, %v5021_v11  ;;  %v2103_v31 = vmul.f32 %v5022_v56, %v5023_v13  ;;  %v5028_v11 = vld [vmem:[#allocation16_spill] sm:$0xff] }
 0x2ef   : > { %2476 = vst [vmem:[%s4514_s20 + $0x150] sm:$0xff] %v2392_v59  ;;  %2477 = vst.msk [vmem:[%s4514_s20 + $0x158] sm:$0xff] %vm795_vm1, %v2393_v58  ;;  %v5024_v59 = vld [vmem:[#allocation23_spill] sm:$0xff]  ;;  %v5025_v58 = vld [vmem:[#allocation25_spill] sm:$0xff] }
 0x2f0   : > { %2482 = vst [vmem:[%s4514_s20 + $0x180] sm:$0xff] %v2398_v39  ;;  %2483 = vst.msk [vmem:[%s4514_s20 + $0x188] sm:$0xff] %vm795_vm1, %v2399_v40  ;;  %v2153_v3 = vpop.permute.xlu1 %2152  ;;  %v2163_v63 = vpop.permute.xlu0 %2162  ;;  %v2108_v14 = vmul.f32 %v4298_v12, %v5024_v59  ;;  %v2109_v39 = vmul.f32 %v4298_v12, %v5025_v58  ;;  %v5031_v58 = vld [vmem:[#allocation19_spill] sm:$0xff] }
 0x2f1   : > { %v2354_v54 = vadd.f32 %v2153_v3, %v2060_v36  ;;  %v2355_v18 = vadd.f32 %v2153_v3, %v2061_v52  ;;  %v2358_v6 = vadd.f32 %v2163_v63, %v2064_v15  ;;  %v2359_v10 = vadd.f32 %v2163_v63, %v2065_v42  ;;  %v5026_v42 = vld [vmem:[#allocation14_spill] sm:$0xff]  ;;  %v5027_v3 = vld [vmem:[#allocation85_spill] sm:$0xff] }
 0x2f2   : > { %v2062_v63 = vmul.f32 %v5027_v3, %v5026_v42  ;;  %v2063_v12 = vmul.f32 %v5027_v3, %v5028_v11 }
 0x2f3   : > { %2438 = vst [vmem:[%s4514_s20 + $0x20] sm:$0xff] %v2354_v54  ;;  %2439 = vst.msk [vmem:[%s4514_s20 + $0x28] sm:$0xff] %vm795_vm1, %v2355_v18  ;;  %v5029_v54 = vld [vmem:[#allocation26_spill] sm:$0xff]  ;;  %v5030_v18 = vld [vmem:[#allocation28_spill] sm:$0xff] }
 0x2f4   : > { %2442 = vst [vmem:[%s4514_s20 + $0x40] sm:$0xff] %v2358_v6  ;;  %2443 = vst.msk [vmem:[%s4514_s20 + $0x48] sm:$0xff] %vm795_vm1, %v2359_v10  ;;  %v2258_v40 = vpop.permute.xlu1 %2257  ;;  %v2273_v36 = vpop.permute.xlu0 %2272  ;;  %v2068_v56 = vmul.f32 %v4307_v43, %v5029_v54  ;;  %v2069_v6 = vmul.f32 %v4307_v43, %v5030_v18 }
 0x2f5   : > { %v2396_v52 = vadd.f32 %v2258_v40, %v2102_v2  ;;  %v2397_v25 = vadd.f32 %v2258_v40, %v2103_v31  ;;  %v2402_v15 = vadd.f32 %v2273_v36, %v2108_v14  ;;  %v2403_v1 = vadd.f32 %v2273_v36, %v2109_v39  ;;  %v5032_v39 = vld [vmem:[#allocation87_spill] sm:$0xff]  ;;  %v5033_v36 = vld [vmem:[#allocation21_spill] sm:$0xff] }
 0x2f6   : > { %v2106_v40 = vmul.f32 %v5032_v39, %v5031_v58  ;;  %v2107_v43 = vmul.f32 %v5032_v39, %v5033_v36  ;;  %v5039_v58 = vld [vmem:[#allocation29_spill] sm:$0xff] }
 0x2f7   : > { %2480 = vst [vmem:[%s4514_s20 + $0x170] sm:$0xff] %v2396_v52  ;;  %2481 = vst.msk [vmem:[%s4514_s20 + $0x178] sm:$0xff] %vm795_vm1, %v2397_v25  ;;  %v5034_v52 = vld [vmem:[#allocation30_spill] sm:$0xff] }
 0x2f8   : > { %2486 = vst [vmem:[%s4514_s20 + $0x1a0] sm:$0xff] %v2402_v15  ;;  %2487 = vst.msk [vmem:[%s4514_s20 + $0x1a8] sm:$0xff] %vm795_vm1, %v2403_v1  ;;  %v2158_v10 = vpop.permute.xlu1 %2157  ;;  %v2173_v2 = vpop.permute.xlu0 %2172  ;;  %v2112_v25 = vmul.f32 %v4319_v32, %v5034_v52  ;;  %v5035_v15 = vld [vmem:[#allocation31_spill] sm:$0xff] }
 0x2f9   : > { %v2356_v13 = vadd.f32 %v2158_v10, %v2062_v63  ;;  %v2357_v31 = vadd.f32 %v2158_v10, %v2063_v12  ;;  %v2362_v59 = vadd.f32 %v2173_v2, %v2068_v56  ;;  %v2363_v14 = vadd.f32 %v2173_v2, %v2069_v6  ;;  %v5036_v56 = vld [vmem:[#allocation22_spill] sm:$0xff]  ;;  %v5037_v6 = vld [vmem:[#allocation24_spill] sm:$0xff] }
 0x2fa   : > { %v2113_v1 = vmul.f32 %v4319_v32, %v5035_v15  ;;  %v2066_v18 = vmul.f32 %v4293_v33, %v5036_v56  ;;  %v2067_v32 = vmul.f32 %v4293_v33, %v5037_v6  ;;  %v2111_v33 = vmul.f32 %v4303_v21, %v5039_v58 }
 0x2fb   : > { %2440 = vst [vmem:[%s4514_s20 + $0x30] sm:$0xff] %v2356_v13  ;;  %2441 = vst.msk [vmem:[%s4514_s20 + $0x38] sm:$0xff] %vm795_vm1, %v2357_v31 }
 0x2fc   : > { %2446 = vst [vmem:[%s4514_s20 + $0x60] sm:$0xff] %v2362_v59  ;;  %2447 = vst.msk [vmem:[%s4514_s20 + $0x68] sm:$0xff] %vm795_vm1, %v2363_v14  ;;  %v2268_v42 = vpop.permute.xlu1 %2267  ;;  %v2283_v3 = vpop.permute.xlu0 %2282  ;;  %v5038_v59 = vld [vmem:[#allocation27_spill] sm:$0xff] }
 0x2fd   : > { %v2400_v63 = vadd.f32 %v2268_v42, %v2106_v40  ;;  %v2401_v11 = vadd.f32 %v2268_v42, %v2107_v43  ;;  %v2406_v12 = vadd.f32 %v2283_v3, %v2112_v25  ;;  %v2407_v54 = vadd.f32 %v2283_v3, %v2113_v1 }
 0x2fe   : > { %v2110_v14 = vmul.f32 %v4303_v21, %v5038_v59 }
 0x2ff   : > { %2484 = vst [vmem:[%s4514_s20 + $0x190] sm:$0xff] %v2400_v63  ;;  %2485 = vst.msk [vmem:[%s4514_s20 + $0x198] sm:$0xff] %vm795_vm1, %v2401_v11 }
 0x300   : > { %2490 = vst [vmem:[%s4514_s20 + $0x1c0] sm:$0xff] %v2406_v12  ;;  %2491 = vst.msk [vmem:[%s4514_s20 + $0x1c8] sm:$0xff] %vm795_vm1, %v2407_v54  ;;  %v2168_v10 = vpop.permute.xlu1 %2167 }
 0x301   : > { %v2360_v2 = vadd.f32 %v2168_v10, %v2066_v18  ;;  %v2361_v13 = vadd.f32 %v2168_v10, %v2067_v32 }
 0x302   : > { %v2183_v31 = vpop.permute.xlu0 %2182 }
 0x303   : > { %2444 = vst [vmem:[%s4514_s20 + $0x50] sm:$0xff] %v2360_v2  ;;  %2445 = vst.msk [vmem:[%s4514_s20 + $0x58] sm:$0xff] %vm795_vm1, %v2361_v13  ;;  %v2366_v39 = vadd.f32 %v2183_v31, %v4331_v4  ;;  %v2367_v40 = vadd.f32 %v2183_v31, %v4334_v41  ;;  %v5040_v13 = vld [vmem:[#allocation33_spill] sm:$0xff]  ;;  %v5041_v31 = vld [vmem:[#allocation35_spill] sm:$0xff] }
 0x304   : > { %v2278_v36 = vpop.permute.xlu1 %2277 }
 0x305   : > { %2450 = vst [vmem:[%s4514_s20 + $0x80] sm:$0xff] %v2366_v39  ;;  %2451 = vst.msk [vmem:[%s4514_s20 + $0x88] sm:$0xff] %vm795_vm1, %v2367_v40  ;;  %v2404_v43 = vadd.f32 %v2278_v36, %v2110_v14  ;;  %v2405_v52 = vadd.f32 %v2278_v36, %v2111_v33  ;;  %v5042_v14 = vld [vmem:[#allocation36_spill] sm:$0xff]  ;;  %v5044_v40 = vld [vmem:[#allocation34_spill] sm:$0xff] }
 0x306   : > { %v5043_v33 = vld [vmem:[#allocation32_spill] sm:$0xff] }
 0x307   : > { %2488 = vst [vmem:[%s4514_s20 + $0x1b0] sm:$0xff] %v2404_v43  ;;  %2489 = vst.msk [vmem:[%s4514_s20 + $0x1b8] sm:$0xff] %vm795_vm1, %v2405_v52 }
 0x308   : > { %v2178_v21 = vpop.permute.xlu1 %2177 }
 0x309   : > { %v2364_v25 = vadd.f32 %v2178_v21, %v4312_v46  ;;  %v2365_v4 = vadd.f32 %v2178_v21, %v4315_v23 }
 0x30a   : > { %v2293_v15 = vpop.permute.xlu0 %2292 }
 0x30b   : > { %2448 = vst [vmem:[%s4514_s20 + $0x70] sm:$0xff] %v2364_v25  ;;  %2449 = vst.msk [vmem:[%s4514_s20 + $0x78] sm:$0xff] %vm795_vm1, %v2365_v4  ;;  %v2410_v41 = vadd.f32 %v2293_v15, %v4346_v7  ;;  %v2411_v1 = vadd.f32 %v2293_v15, %v4349_v62  ;;  %v5045_v25 = vld [vmem:[#allocation38_spill] sm:$0xff]  ;;  %v5046_v15 = vld [vmem:[#allocation37_spill] sm:$0xff] }
 0x30c   : > { %v2288_v42 = vpop.permute.xlu1 %2287 }
 0x30d   : > { %2494 = vst [vmem:[%s4514_s20 + $0x1e0] sm:$0xff] %v2410_v41  ;;  %2495 = vst.msk [vmem:[%s4514_s20 + $0x1e8] sm:$0xff] %vm795_vm1, %v2411_v1  ;;  %v2408_v46 = vadd.f32 %v2288_v42, %v4324_v27  ;;  %v2409_v23 = vadd.f32 %v2288_v42, %v4327_v26 }
 0x30f   : > { %2492 = vst [vmem:[%s4514_s20 + $0x1d0] sm:$0xff] %v2408_v46  ;;  %2493 = vst.msk [vmem:[%s4514_s20 + $0x1d8] sm:$0xff] %vm795_vm1, %v2409_v23  ;;  %v5047_v46 = vld [vmem:[#allocation39_spill] sm:$0xff] }
 0x310   : > { %v2188_v3 = vpop.permute.xlu1 %2187 }
 0x311   : > { %v2368_v7 = vadd.f32 %v2188_v3, %v4339_v60  ;;  %v2369_v62 = vadd.f32 %v2188_v3, %v4342_v49  ;;  %v5048_v3 = vld [vmem:[#allocation41_spill] sm:$0xff] }
 0x312   : > { %v2193_v63 = vpop.permute.xlu0 %2192 }
 0x313   : > { %2452 = vst [vmem:[%s4514_s20 + $0x90] sm:$0xff] %v2368_v7  ;;  %2453 = vst.msk [vmem:[%s4514_s20 + $0x98] sm:$0xff] %vm795_vm1, %v2369_v62  ;;  %v2370_v27 = vadd.f32 %v2193_v63, %v4361_v38  ;;  %v2371_v26 = vadd.f32 %v2193_v63, %v4364_v47 }
 0x315   : > { %2454 = vst [vmem:[%s4514_s20 + $0xa0] sm:$0xff] %v2370_v27  ;;  %2455 = vst.msk [vmem:[%s4514_s20 + $0xa8] sm:$0xff] %vm795_vm1, %v2371_v26  ;;  %v5049_v27 = vld [vmem:[#allocation43_spill] sm:$0xff] }
 0x316   : > { %v2298_v11 = vpop.permute.xlu1 %2297 }
 0x317   : > { %v2412_v60 = vadd.f32 %v2298_v11, %v4355_v48  ;;  %v2413_v49 = vadd.f32 %v2298_v11, %v4358_v19  ;;  %v5050_v11 = vld [vmem:[#allocation40_spill] sm:$0xff] }
 0x319   : > { %2496 = vst [vmem:[%s4514_s20 + $0x1f0] sm:$0xff] %v2412_v60  ;;  %2497 = vst.msk [vmem:[%s4514_s20 + $0x1f8] sm:$0xff] %vm795_vm1, %v2413_v49 }
 0x31a   : > { %v2303_v12 = vpop.permute.xlu0 %2302 }
 0x31b   : > { %v2414_v38 = vadd.f32 %v2303_v12, %v4375_v0  ;;  %v2415_v47 = vadd.f32 %v2303_v12, %v4378_v50  ;;  %v5051_v12 = vld [vmem:[#allocation42_spill] sm:$0xff] }
 0x31d   : > { %2498 = vst [vmem:[%s4514_s20 + $0x200] sm:$0xff] %v2414_v38  ;;  %2499 = vst.msk [vmem:[%s4514_s20 + $0x208] sm:$0xff] %vm795_vm1, %v2415_v47 }
 0x31e   : > { %v2198_v54 = vpop.permute.xlu1 %2197 }
 0x31f   : > { %v2372_v48 = vadd.f32 %v2198_v54, %v4369_v51  ;;  %v2373_v19 = vadd.f32 %v2198_v54, %v4372_v5  ;;  %v5052_v54 = vld [vmem:[#allocation47_spill] sm:$0xff] }
 0x321   : > { %2456 = vst [vmem:[%s4514_s20 + $0xb0] sm:$0xff] %v2372_v48  ;;  %2457 = vst.msk [vmem:[%s4514_s20 + $0xb8] sm:$0xff] %vm795_vm1, %v2373_v19 }
 0x322   : > { %v2203_v56 = vpop.permute.xlu0 %2202 }
 0x323   : > { %v2374_v0 = vadd.f32 %v2203_v56, %v4389_v61  ;;  %v2375_v50 = vadd.f32 %v2203_v56, %v4392_v16 }
 0x325   : > { %2458 = vst [vmem:[%s4514_s20 + $0xc0] sm:$0xff] %v2374_v0  ;;  %2459 = vst.msk [vmem:[%s4514_s20 + $0xc8] sm:$0xff] %vm795_vm1, %v2375_v50  ;;  %v5053_v0 = vld [vmem:[#allocation46_spill] sm:$0xff] }
 0x326   : > { %v2308_v18 = vpop.permute.xlu1 %2307 }
 0x327   : > { %v2416_v51 = vadd.f32 %v2308_v18, %v4383_v9  ;;  %v2417_v5 = vadd.f32 %v2308_v18, %v4386_v24  ;;  %v5054_v18 = vld [vmem:[#allocation45_spill] sm:$0xff] }
 0x329   : > { %2500 = vst [vmem:[%s4514_s20 + $0x210] sm:$0xff] %v2416_v51  ;;  %2501 = vst.msk [vmem:[%s4514_s20 + $0x218] sm:$0xff] %vm795_vm1, %v2417_v5 }
 0x32a   : > { %v2313_v6 = vpop.permute.xlu0 %2312 }
 0x32b   : > { %v2418_v61 = vadd.f32 %v2313_v6, %v4403_v44  ;;  %v2419_v16 = vadd.f32 %v2313_v6, %v4406_v29  ;;  %v5056_v6 = vld [vmem:[#allocation44_spill] sm:$0xff] }
 0x32d   : > { %2502 = vst [vmem:[%s4514_s20 + $0x220] sm:$0xff] %v2418_v61  ;;  %2503 = vst.msk [vmem:[%s4514_s20 + $0x228] sm:$0xff] %vm795_vm1, %v2419_v16 }
 0x32e   : > { %v2208_v32 = vpop.permute.xlu1 %2207 }
 0x32f   : > { %v2376_v9 = vadd.f32 %v2208_v32, %v4397_v22  ;;  %v2377_v24 = vadd.f32 %v2208_v32, %v4400_v35 }
 0x331   : > { %2460 = vst [vmem:[%s4514_s20 + $0xd0] sm:$0xff] %v2376_v9  ;;  %2461 = vst.msk [vmem:[%s4514_s20 + $0xd8] sm:$0xff] %vm795_vm1, %v2377_v24 }
 0x332   : > { %v2213_v10 = vpop.permute.xlu0 %2212 }
 0x333   : > { %v2378_v44 = vadd.f32 %v2213_v10, %v4417_v30  ;;  %v2379_v29 = vadd.f32 %v2213_v10, %v4420_v57 }
 0x335   : > { %2462 = vst [vmem:[%s4514_s20 + $0xe0] sm:$0xff] %v2378_v44  ;;  %2463 = vst.msk [vmem:[%s4514_s20 + $0xe8] sm:$0xff] %vm795_vm1, %v2379_v29 }
 0x336   : > { %v2318_v2 = vpop.permute.xlu1 %2317 }
 0x337   : > { %v2420_v22 = vadd.f32 %v2318_v2, %v5040_v13  ;;  %v2421_v35 = vadd.f32 %v2318_v2, %v5041_v31 }
 0x339   : > { %2504 = vst [vmem:[%s4514_s20 + $0x230] sm:$0xff] %v2420_v22  ;;  %2505 = vst.msk [vmem:[%s4514_s20 + $0x238] sm:$0xff] %vm795_vm1, %v2421_v35 }
 0x33a   : > { %v2323_v59 = vpop.permute.xlu0 %2322 }
 0x33b   : > { %v2422_v30 = vadd.f32 %v2323_v59, %v5042_v14  ;;  %v2423_v57 = vadd.f32 %v2323_v59, %v4434_v17 }
 0x33d   : > { %2506 = vst [vmem:[%s4514_s20 + $0x240] sm:$0xff] %v2422_v30  ;;  %2507 = vst.msk [vmem:[%s4514_s20 + $0x248] sm:$0xff] %vm795_vm1, %v2423_v57 }
 0x33e   : > { %v2218_v58 = vpop.permute.xlu1 %2217 }
 0x33f   : > { %v2380_v39 = vadd.f32 %v2218_v58, %v5043_v33  ;;  %v2381_v36 = vadd.f32 %v2218_v58, %v5044_v40 }
 0x341   : > { %2464 = vst [vmem:[%s4514_s20 + $0xf0] sm:$0xff] %v2380_v39  ;;  %2465 = vst.msk [vmem:[%s4514_s20 + $0xf8] sm:$0xff] %vm795_vm1, %v2381_v36 }
 0x342   : > { %v2223_v43 = vpop.permute.xlu0 %2222 }
 0x343   : > { %v2382_v52 = vadd.f32 %v2223_v43, %v4445_v8  ;;  %v2383_v17 = vadd.f32 %v2223_v43, %v4448_v28 }
 0x345   : > { %2466 = vst [vmem:[%s4514_s20 + $0x100] sm:$0xff] %v2382_v52  ;;  %2467 = vst.msk [vmem:[%s4514_s20 + $0x108] sm:$0xff] %vm795_vm1, %v2383_v17 }
 0x346   : > { %v2328_v21 = vpop.permute.xlu1 %2327 }
 0x347   : > { %v2424_v4 = vadd.f32 %v2328_v21, %v5045_v25  ;;  %v2425_v41 = vadd.f32 %v2328_v21, %v5046_v15 }
 0x349   : > { %2508 = vst [vmem:[%s4514_s20 + $0x250] sm:$0xff] %v2424_v4  ;;  %2509 = vst.msk [vmem:[%s4514_s20 + $0x258] sm:$0xff] %vm795_vm1, %v2425_v41 }
 0x34a   : > { %v2333_v1 = vpop.permute.xlu0 %2332 }
 0x34b   : > { %v2426_v8 = vadd.f32 %v2333_v1, %v4459_v45  ;;  %v2427_v28 = vadd.f32 %v2333_v1, %v4462_v53 }
 0x34d   : > { %2510 = vst [vmem:[%s4514_s20 + $0x260] sm:$0xff] %v2426_v8  ;;  %2511 = vst.msk [vmem:[%s4514_s20 + $0x268] sm:$0xff] %vm795_vm1, %v2427_v28 }
 0x34e   : > { %v2228_v42 = vpop.permute.xlu1 %2227 }
 0x34f   : > { %v2384_v23 = vadd.f32 %v2228_v42, %v5047_v46  ;;  %v2385_v7 = vadd.f32 %v2228_v42, %v5048_v3 }
 0x351   : > { %2468 = vst [vmem:[%s4514_s20 + $0x110] sm:$0xff] %v2384_v23  ;;  %2469 = vst.msk [vmem:[%s4514_s20 + $0x118] sm:$0xff] %vm795_vm1, %v2385_v7 }
 0x352   : > { %v2233_v62 = vpop.permute.xlu0 %2232 }
 0x353   : > { %v2386_v45 = vadd.f32 %v2233_v62, %v4473_v55  ;;  %v2387_v53 = vadd.f32 %v2233_v62, %v4476_v20 }
 0x355   : > { %2470 = vst [vmem:[%s4514_s20 + $0x120] sm:$0xff] %v2386_v45  ;;  %2471 = vst.msk [vmem:[%s4514_s20 + $0x128] sm:$0xff] %vm795_vm1, %v2387_v53 }
 0x356   : > { %v2338_v63 = vpop.permute.xlu1 %2337 }
 0x357   : > { %v2428_v26 = vadd.f32 %v2338_v63, %v5049_v27  ;;  %v2429_v60 = vadd.f32 %v2338_v63, %v5050_v11 }
 0x359   : > { %2512 = vst [vmem:[%s4514_s20 + $0x270] sm:$0xff] %v2428_v26  ;;  %2513 = vst.msk [vmem:[%s4514_s20 + $0x278] sm:$0xff] %vm795_vm1, %v2429_v60 }
 0x35e   : > { %v2238_v49 = vpop.permute.xlu1 %2237 }
 0x35f   : > { %v2388_v38 = vadd.f32 %v2238_v49, %v5051_v12  ;;  %v2389_v55 = vadd.f32 %v2238_v49, %v4484_v37  ;;  %v5055_v37 = vld [vmem:[#allocation76_spill] sm:$0xff] }
 0x361   : > { %2472 = vst [vmem:[%s4514_s20 + $0x130] sm:$0xff] %v2388_v38  ;;  %2473 = vst.msk [vmem:[%s4514_s20 + $0x138] sm:$0xff] %vm795_vm1, %v2389_v55 }
 0x362   : > { %v2243_v20 = vpop.permute.xlu0 %2242 }
 0x363   : > { %v2390_v47 = vadd.f32 %v2243_v20, %v4501_v34  ;;  %v2391_v48 = vadd.f32 %v2243_v20, %v5052_v54 }
 0x365   : > { %2474 = vst [vmem:[%s4514_s20 + $0x140] sm:$0xff] %v2390_v47  ;;  %2475 = vst.msk [vmem:[%s4514_s20 + $0x148] sm:$0xff] %vm795_vm1, %v2391_v48 }
 0x366   : > { %v2348_v19 = vpop.permute.xlu1 %2347  ;;  %v2343_v56 = vpop.permute.xlu0 %2342 }
 0x367   : > { %v2432_v50 = vadd.f32 %v2348_v19, %v5053_v0  ;;  %v2433_v51 = vadd.f32 %v2348_v19, %v5054_v18  ;;  %v2430_v5 = vadd.f32 %v2343_v56, %v5055_v37  ;;  %v2431_v61 = vadd.f32 %v2343_v56, %v5056_v6 }
 0x369   : > { %2516 = vst [vmem:[%s4514_s20 + $0x290] sm:$0xff] %v2432_v50  ;;  %2517 = vst.msk [vmem:[%s4514_s20 + $0x298] sm:$0xff] %vm795_vm1, %v2433_v51 }
 0x36a   : > { %2514 = vst [vmem:[%s4514_s20 + $0x280] sm:$0xff] %v2430_v5  ;;  %2515 = vst.msk [vmem:[%s4514_s20 + $0x288] sm:$0xff] %vm795_vm1, %v2431_v61 }
 0x36b PF: > { %s14_s15 = sadd.s32 1, %s2797_s15  }
 0x36c   : > { %p11_p4 = scmp.ge.s32.totalorder %s14_s15, 4  }
 0x36e   :  { %13 = sbr.rel (!%p11_p4) target bundleno = 1 (0x1), region = 69 }

</bundles_post_ra>
